<compile_context>
chip_gen: v7x
topology: tpu7x:2x2x1
jax: 0.10.0
libtpu: 0.0.40
codegen_flags: <defaults>
</compile_context>

<pallas_src>
import jax
import jax.numpy as jnp
from jax import lax
from jax.experimental import pallas as pl
from jax.experimental.pallas import tpu as pltpu


# -----------------------------------------------------------------------------
# Fused kernel.
#   step 0    : acc = 0 ; txt_emb = normalize(txt @ W_tp + b_tp)   (hidden
#               under the step-1 weight DMA)
#   every step: acc += x[:, tile] @ W_fused[tile, :]     (f32 accumulate)
#   last step : img_emb = normalize(acc + b_ip)
#               logits  = (img_emb . txt_emb^T) * (1 / temperature)
# -----------------------------------------------------------------------------
def _fused_clip_kernel(
    x_ref,        # (B, tile_k)    f32   image pixels (flattened NCHW) tile
    wf_ref,       # (tile_k, 512)  bf16  fused stem@image_projection weight tile
    bip_ref,      # (1, 512)       f32   image_projection bias
    txt_ref,      # (B, 768)       f32   text last-token features (resident)
    wtp_ref,      # (768, 512)     bf16  text_projection weight (resident)
    btp_ref,      # (1, 512)       f32   text_projection bias
    invt_ref,     # (1,)           f32   1 / temperature, in SMEM
    logits_ref,   # (B, B)         f32   output
    acc_ref,      # (B, 512)       f32   VMEM scratch accumulator (image emb)
    txt_emb_ref,  # (B, 512)       f32   VMEM scratch normalized text emb
):
    j = pl.program_id(0)
    eps2 = jnp.float32(1e-24)  # F.normalize eps=1e-12, squared

    @pl.when(j == 0)
    def _():
        acc_ref[...] = jnp.zeros_like(acc_ref)
        # Text branch on step 0 so it overlaps with the next weight-tile DMA.
        te = (
            jnp.dot(
                txt_ref[...],
                wtp_ref[...].astype(jnp.float32),
                preferred_element_type=jnp.float32,
            )
            + btp_ref[...]
        )
        # F.normalize: x * rsqrt(max(sum(x^2), eps^2)) -> EUP rsqrt, no divide.
        txt_emb_ref[...] = te * lax.rsqrt(
            jnp.maximum(jnp.sum(te * te, axis=-1, keepdims=True), eps2)
        )

    # Folded image path: x tile (f32) @ W_fused tile (bf16 upcast), f32 acc.
    acc_ref[...] += jnp.dot(
        x_ref[...],
        wf_ref[...].astype(jnp.float32),
        preferred_element_type=jnp.float32,
    )

    @pl.when(j == pl.num_programs(0) - 1)
    def _():
        ie = acc_ref[...] + bip_ref[...]
        ie = ie * lax.rsqrt(
            jnp.maximum(jnp.sum(ie * ie, axis=-1, keepdims=True), eps2)
        )
        # img_emb @ txt_emb.T without an explicit transpose: contract last dims.
        logits = lax.dot_general(
            ie,
            txt_emb_ref[...],
            dimension_numbers=(((1,), (1,)), ((), ())),
            preferred_element_type=jnp.float32,
        )
        logits_ref[...] = logits * invt_ref[0]


def fused_clip(x_flat, w_fused, b_ip, txt_feat, w_tp, b_tp, inv_temp,
               *, tile_k=1024):
    B, K = x_flat.shape
    Kw, D = w_fused.shape
    assert Kw == K
    if K % tile_k != 0:
        tile_k = K  # fall back to a single resident tile
    Kt = txt_feat.shape[1]
    grid = (K // tile_k,)

    def nbytes(a):
        return a.size * a.dtype.itemsize

    cost = pl.CostEstimate(
        flops=2 * B * K * D + 2 * B * Kt * D + 2 * B * D * B,
        transcendentals=2 * B,  # one rsqrt per row, both branches
        bytes_accessed=(
            nbytes(x_flat) + nbytes(w_fused) + nbytes(b_ip) + nbytes(txt_feat)
            + nbytes(w_tp) + nbytes(b_tp) + nbytes(inv_temp) + B * B * 4
        ),
    )

    return pl.pallas_call(
        _fused_clip_kernel,
        out_shape=jax.ShapeDtypeStruct((B, B), jnp.float32),
        grid_spec=pltpu.PrefetchScalarGridSpec(
            num_scalar_prefetch=0,
            grid=grid,
            in_specs=[
                pl.BlockSpec((B, tile_k), lambda j: (0, j)),       # x K-tile
                pl.BlockSpec((tile_k, D), lambda j: (j, 0)),       # fused weight tile
                pl.BlockSpec((1, D), lambda j: (0, 0)),            # b_ip
                pl.BlockSpec((B, Kt), lambda j: (0, 0)),           # text features
                pl.BlockSpec((Kt, D), lambda j: (0, 0)),           # text proj (bf16)
                pl.BlockSpec((1, D), lambda j: (0, 0)),            # b_tp
                pl.BlockSpec(memory_space=pltpu.MemorySpace.SMEM), # 1/temperature
            ],
            out_specs=pl.BlockSpec((B, B), lambda j: (0, 0)),
            scratch_shapes=[
                pltpu.VMEM((B, D), jnp.float32),   # image-embedding accumulator
                pltpu.VMEM((B, D), jnp.float32),   # normalized text embeddings
            ],
        ),
        compiler_params=pltpu.CompilerParams(
            # Single grid axis is a reduction into the shared accumulator.
            dimension_semantics=("arbitrary",),
            # Post-fold footprint is ~4 MiB double-buffered; explicit limit kept
            # for headroom, well inside v5e/v6e/v7x physical VMEM.
            vmem_limit_bytes=32 * 1024 * 1024,
        ),
        cost_estimate=cost,
    )(x_flat, w_fused, b_ip, txt_feat, w_tp, b_tp, inv_temp)


# -----------------------------------------------------------------------------
# Parameter construction (deterministic, PyTorch-Linear-style uniform init).
# -----------------------------------------------------------------------------
def _linear_init(key, fan_in, fan_out):
    kw, kb = jax.random.split(key)
    bound = 1.0 / jnp.sqrt(jnp.float32(fan_in))
    w = jax.random.uniform(kw, (fan_in, fan_out), jnp.float32, -bound, bound)
    b = jax.random.uniform(kb, (1, fan_out), jnp.float32, -bound, bound)
    return w, b


def make_params(key, *, img_flat_dim, vocab_size):
    keys = jax.random.split(key, 4)
    # Stand-in backbones (deterministic), kept in f32 as the "ground truth".
    w_img_stem = jax.random.normal(
        keys[0], (img_flat_dim, 2048), jnp.float32
    ) / jnp.sqrt(jnp.float32(img_flat_dim))
    txt_embed = jax.random.normal(keys[1], (vocab_size, 768), jnp.float32) * 0.02
    # CLIP head parameters declared by the module's __init__
    w_ip, b_ip = _linear_init(keys[2], 2048, 512)   # image_projection
    w_tp, b_tp = _linear_init(keys[3], 768, 512)    # text_projection
    temperature = jnp.array([0.07], dtype=jnp.float32)
    return dict(
        w_img_stem=w_img_stem, txt_embed=txt_embed,
        w_ip=w_ip, b_ip=b_ip, w_tp=w_tp, b_tp=b_tp,
        temperature=temperature,
    )


def prepare_inference_params(params):
    """One-time inference prep: fold stem@image_projection, bf16 weight streams."""
    hp = lax.Precision.HIGHEST
    w_fused = jnp.dot(
        params["w_img_stem"], params["w_ip"], precision=hp
    ).astype(jnp.bfloat16)                              # (img_flat, 512) bf16
    return dict(
        w_fused=w_fused,
        b_ip=params["b_ip"],
        txt_embed=params["txt_embed"],
        w_tp=params["w_tp"].astype(jnp.bfloat16),       # bf16 stream, f32 acc
        b_tp=params["b_tp"],
        inv_temp=(1.0 / params["temperature"]).astype(jnp.float32),
    )


@jax.jit
def simple_clip_forward(infer_params, image_nchw, text_tokens):
    B = image_nchw.shape[0]
    # ---- image path input: NCHW flattened, kept in f32 (tiny, accuracy) ----
    x_flat = image_nchw.reshape(B, -1)
    # ---- text path (backbone stand-in: last-token embedding lookup) ----
    last_tok = text_tokens[:, -1]
    text_features = jnp.take(infer_params["txt_embed"], last_tok, axis=0)  # (B,768)
    # ---- single fused Pallas kernel: folded stem+proj, text proj, norm, logits ----
    return fused_clip(
        x_flat,
        infer_params["w_fused"],
        infer_params["b_ip"],
        text_features,
        infer_params["w_tp"],
        infer_params["b_tp"],
        infer_params["inv_temp"],
    )                                                                      # (B, B)


def _reference(params, image_nchw, text_tokens):
    """Unfused full-f32 reference following the module's forward."""
    hp = lax.Precision.HIGHEST
    B = image_nchw.shape[0]
    x = image_nchw.reshape(B, -1)
    img_feat = jnp.dot(x, params["w_img_stem"], precision=hp)
    txt_feat = jnp.take(params["txt_embed"], text_tokens[:, -1], axis=0)
    ie = jnp.dot(img_feat, params["w_ip"], precision=hp) + params["b_ip"]
    te = jnp.dot(txt_feat, params["w_tp"], precision=hp) + params["b_tp"]
    ie = ie / jnp.maximum(jnp.linalg.norm(ie, axis=-1, keepdims=True), 1e-12)
    te = te / jnp.maximum(jnp.linalg.norm(te, axis=-1, keepdims=True), 1e-12)
    return jnp.dot(ie, te.T, precision=hp) / params["temperature"][0]


if __name__ == "__main__":
    B, C, H, W = 8, 3, 32, 32          # img_flat_dim = 3072 (lane-aligned)
    SEQ, VOCAB = 12, 128

    key = jax.random.PRNGKey(0)
    k_img, k_txt, k_par = jax.random.split(key, 3)

    image = jax.random.normal(k_img, (B, C, H, W), jnp.float32)   # NCHW
    text = jax.random.randint(k_txt, (B, SEQ), 0, VOCAB, jnp.int32)

    params = make_params(k_par, img_flat_dim=C * H * W, vocab_size=VOCAB)
    infer_params = prepare_inference_params(params)

    logits = simple_clip_forward(infer_params, image, text)
    logits = jax.block_until_ready(logits)

    ref = _reference(params, image, text)
    assert logits.shape == (B, B)
    # Tolerance covers bf16 quantization of the folded W_fused / W_tp weight
    # streams (x and all accumulation stay f32); the 1/temperature (~14.3x)
    # scale amplifies the ~1e-3-level embedding perturbation into the logits.
    assert jnp.allclose(logits, ref, atol=3e-2, rtol=3e-2)

    print("KERNEL_OK")
</pallas_src>

<mosaic_0001>
module attributes {stable_mosaic.version = 11 : i64} {
  func.func @_fused_clip_kernel(%arg0: i32, %arg1: memref<8x1024xf32, #tpu.memory_space<vmem>>, %arg2: memref<1024x512xbf16, #tpu.memory_space<vmem>>, %arg3: memref<1x512xf32, #tpu.memory_space<vmem>>, %arg4: memref<8x768xf32, #tpu.memory_space<vmem>>, %arg5: memref<768x512xbf16, #tpu.memory_space<vmem>>, %arg6: memref<1x512xf32, #tpu.memory_space<vmem>>, %arg7: memref<1xf32, #tpu.memory_space<smem>>, %arg8: memref<8x8xf32, #tpu.memory_space<vmem>>, %arg9: memref<8x512xf32, #tpu.memory_space<vmem>>, %arg10: memref<8x512xf32, #tpu.memory_space<vmem>>) attributes {dimension_semantics = [#tpu.dimension_semantics<arbitrary>], iteration_bounds = array<i64: 3>, scalar_prefetch = 0 : i64, scratch_operands = 2 : i64, tpu.core_type = #tpu.core_type<tc>, window_params = [{transform_indices = @transform_0, window_bounds = array<i64: 8, 1024>}, {transform_indices = @transform_1, window_bounds = array<i64: 1024, 512>}, {pipeline_mode = #tpu.pipeline_mode<synchronous>, transform_indices = @transform_2, window_bounds = array<i64: 1, 512>}, {pipeline_mode = #tpu.pipeline_mode<synchronous>, transform_indices = @transform_3, window_bounds = array<i64: 8, 768>}, {pipeline_mode = #tpu.pipeline_mode<synchronous>, transform_indices = @transform_4, window_bounds = array<i64: 768, 512>}, {pipeline_mode = #tpu.pipeline_mode<synchronous>, transform_indices = @transform_5, window_bounds = array<i64: 1, 512>}, {transform_indices = @transform_6, window_bounds = array<i64: 1>}, {pipeline_mode = #tpu.pipeline_mode<synchronous>, transform_indices = @transform_7, window_bounds = array<i64: 8, 8>}]} {
    %c0_i32 = arith.constant 0 : i32
    %0 = arith.cmpi eq, %arg0, %c0_i32 : i32
    %1 = arith.extui %0 : i1 to i32
    %cst = arith.constant 1.000000e-24 : f32
    %c0_i32_0 = arith.constant 0 : i32
    %2 = arith.cmpi ne, %1, %c0_i32_0 : i32
    scf.if %2 {
      %cst_11 = arith.constant 0.000000e+00 : f32
      %13 = vector.broadcast %cst_11 : f32 to vector<8x512xf32>
      %c0_12 = arith.constant 0 : index
      %c0_13 = arith.constant 0 : index
      %14 = vector.load %arg9[%c0_12, %c0_13] : memref<8x512xf32, #tpu.memory_space<vmem>>, vector<8x512xf32>
      tpu.vector_store %arg9[%c0_12, %c0_13], %13 {strides = array<i32>} : memref<8x512xf32, #tpu.memory_space<vmem>>, vector<8x512xf32>,
      %c0_14 = arith.constant 0 : index
      %c0_15 = arith.constant 0 : index
      %15 = vector.load %arg4[%c0_14, %c0_15] : memref<8x768xf32, #tpu.memory_space<vmem>>, vector<8x768xf32>
      %c0_16 = arith.constant 0 : index
      %c0_17 = arith.constant 0 : index
      %16 = vector.load %arg5[%c0_16, %c0_17] : memref<768x512xbf16, #tpu.memory_space<vmem>>, vector<768x512xbf16>
      %17 = arith.extf %16 : vector<768x512xbf16> to vector<768x512xf32>
      %cst_18 = arith.constant dense<0.000000e+00> : vector<8x512xf32>
      %18 = tpu.matmul %15, %17, %cst_18 {dimension_numbers = #tpu.dot_dimension_numbers<[1], [0], [0], [1], [0, 0, 1, 1], [], []>} : vector<8x768xf32>, vector<768x512xf32>, vector<8x512xf32> -> vector<8x512xf32>
      %c0_19 = arith.constant 0 : index
      %c0_20 = arith.constant 0 : index
      %19 = vector.load %arg6[%c0_19, %c0_20] : memref<1x512xf32, #tpu.memory_space<vmem>>, vector<1x512xf32>
      %20 = vector.broadcast %19 : vector<1x512xf32> to vector<8x512xf32>
      %21 = arith.addf %18, %20 : vector<8x512xf32>
      %22 = arith.mulf %21, %21 : vector<8x512xf32>
      %cst_21 = arith.constant dense<0.000000e+00> : vector<8xf32>
      %23 = vector.multi_reduction <add>, %22, %cst_21 [1] : vector<8x512xf32> to vector<8xf32>
      %24 = vector.shape_cast %23 : vector<8xf32> to vector<8x1xf32>
      %25 = vector.broadcast %cst : f32 to vector<8x1xf32>
      %26 = arith.maximumf %24, %25 : vector<8x1xf32>
      %27 = math.rsqrt %26 : vector<8x1xf32>
      %28 = vector.broadcast %27 : vector<8x1xf32> to vector<8x512xf32>
      %29 = arith.mulf %21, %28 : vector<8x512xf32>
      %c0_22 = arith.constant 0 : index
      %c0_23 = arith.constant 0 : index
      %30 = vector.load %arg10[%c0_22, %c0_23] : memref<8x512xf32, #tpu.memory_space<vmem>>, vector<8x512xf32>
      tpu.vector_store %arg10[%c0_22, %c0_23], %29 {strides = array<i32>} : memref<8x512xf32, #tpu.memory_space<vmem>>, vector<8x512xf32>,
    } else {
    }
    %c0 = arith.constant 0 : index
    %c0_1 = arith.constant 0 : index
    %3 = vector.load %arg9[%c0, %c0_1] : memref<8x512xf32, #tpu.memory_space<vmem>>, vector<8x512xf32>
    %c0_2 = arith.constant 0 : index
    %c0_3 = arith.constant 0 : index
    %4 = vector.load %arg1[%c0_2, %c0_3] : memref<8x1024xf32, #tpu.memory_space<vmem>>, vector<8x1024xf32>
    %c0_4 = arith.constant 0 : index
    %c0_5 = arith.constant 0 : index
    %5 = vector.load %arg2[%c0_4, %c0_5] : memref<1024x512xbf16, #tpu.memory_space<vmem>>, vector<1024x512xbf16>
    %6 = arith.extf %5 : vector<1024x512xbf16> to vector<1024x512xf32>
    %cst_6 = arith.constant dense<0.000000e+00> : vector<8x512xf32>
    %7 = tpu.matmul %4, %6, %cst_6 {dimension_numbers = #tpu.dot_dimension_numbers<[1], [0], [0], [1], [0, 0, 1, 1], [], []>} : vector<8x1024xf32>, vector<1024x512xf32>, vector<8x512xf32> -> vector<8x512xf32>
    %8 = arith.addf %3, %7 : vector<8x512xf32>
    %c0_7 = arith.constant 0 : index
    %c0_8 = arith.constant 0 : index
    %9 = vector.load %arg9[%c0_7, %c0_8] : memref<8x512xf32, #tpu.memory_space<vmem>>, vector<8x512xf32>
    tpu.vector_store %arg9[%c0_7, %c0_8], %8 {strides = array<i32>} : memref<8x512xf32, #tpu.memory_space<vmem>>, vector<8x512xf32>,
    %c2_i32 = arith.constant 2 : i32
    %10 = arith.cmpi eq, %arg0, %c2_i32 : i32
    %11 = arith.extui %10 : i1 to i32
    %cst_9 = arith.constant 1.000000e-24 : f32
    %c0_i32_10 = arith.constant 0 : i32
    %12 = arith.cmpi ne, %11, %c0_i32_10 : i32
    scf.if %12 {
      %c0_11 = arith.constant 0 : index
      %c0_12 = arith.constant 0 : index
      %13 = vector.load %arg9[%c0_11, %c0_12] : memref<8x512xf32, #tpu.memory_space<vmem>>, vector<8x512xf32>
      %c0_13 = arith.constant 0 : index
      %c0_14 = arith.constant 0 : index
      %14 = vector.load %arg3[%c0_13, %c0_14] : memref<1x512xf32, #tpu.memory_space<vmem>>, vector<1x512xf32>
      %15 = vector.broadcast %14 : vector<1x512xf32> to vector<8x512xf32>
      %16 = arith.addf %13, %15 : vector<8x512xf32>
      %17 = arith.mulf %16, %16 : vector<8x512xf32>
      %cst_15 = arith.constant dense<0.000000e+00> : vector<8xf32>
      %18 = vector.multi_reduction <add>, %17, %cst_15 [1] : vector<8x512xf32> to vector<8xf32>
      %19 = vector.shape_cast %18 : vector<8xf32> to vector<8x1xf32>
      %20 = vector.broadcast %cst_9 : f32 to vector<8x1xf32>
      %21 = arith.maximumf %19, %20 : vector<8x1xf32>
      %22 = math.rsqrt %21 : vector<8x1xf32>
      %23 = vector.broadcast %22 : vector<8x1xf32> to vector<8x512xf32>
      %24 = arith.mulf %16, %23 : vector<8x512xf32>
      %c0_16 = arith.constant 0 : index
      %c0_17 = arith.constant 0 : index
      %25 = vector.load %arg10[%c0_16, %c0_17] : memref<8x512xf32, #tpu.memory_space<vmem>>, vector<8x512xf32>
      %cst_18 = arith.constant dense<0.000000e+00> : vector<8x8xf32>
      %26 = tpu.matmul %24, %25, %cst_18 {dimension_numbers = #tpu.dot_dimension_numbers<[1], [1], [0], [0], [0, 0, 1, 0], [], []>} : vector<8x512xf32>, vector<8x512xf32>, vector<8x8xf32> -> vector<8x8xf32>
      %c0_19 = arith.constant 0 : index
      %27 = memref.load %arg7[%c0_19] : memref<1xf32, #tpu.memory_space<smem>>
      %28 = vector.broadcast %27 : f32 to vector<8x8xf32>
      %29 = arith.mulf %26, %28 : vector<8x8xf32>
      %c0_20 = arith.constant 0 : index
      %c0_21 = arith.constant 0 : index
      %30 = vector.load %arg8[%c0_20, %c0_21] : memref<8x8xf32, #tpu.memory_space<vmem>>, vector<8x8xf32>
      tpu.vector_store %arg8[%c0_20, %c0_21], %29 {strides = array<i32>} : memref<8x8xf32, #tpu.memory_space<vmem>>, vector<8x8xf32>,
    } else {
    }
    return
  }
  func.func @transform_0(%arg0: i32) -> (i32, i32) {
    %c0_i32 = arith.constant 0 : i32
    %c0_i32_0 = arith.constant 0 : i32
    return %c0_i32, %arg0 : i32, i32
  }
  func.func @transform_1(%arg0: i32) -> (i32, i32) {
    %c0_i32 = arith.constant 0 : i32
    %c0_i32_0 = arith.constant 0 : i32
    return %arg0, %c0_i32 : i32, i32
  }
  func.func @transform_2(%arg0: i32) -> (i32, i32) {
    %c0_i32 = arith.constant 0 : i32
    %c0_i32_0 = arith.constant 0 : i32
    %c0_i32_1 = arith.constant 0 : i32
    return %c0_i32, %c0_i32_0 : i32, i32
  }
  func.func @transform_3(%arg0: i32) -> (i32, i32) {
    %c0_i32 = arith.constant 0 : i32
    %c0_i32_0 = arith.constant 0 : i32
    %c0_i32_1 = arith.constant 0 : i32
    return %c0_i32, %c0_i32_0 : i32, i32
  }
  func.func @transform_4(%arg0: i32) -> (i32, i32) {
    %c0_i32 = arith.constant 0 : i32
    %c0_i32_0 = arith.constant 0 : i32
    %c0_i32_1 = arith.constant 0 : i32
    return %c0_i32, %c0_i32_0 : i32, i32
  }
  func.func @transform_5(%arg0: i32) -> (i32, i32) {
    %c0_i32 = arith.constant 0 : i32
    %c0_i32_0 = arith.constant 0 : i32
    %c0_i32_1 = arith.constant 0 : i32
    return %c0_i32, %c0_i32_0 : i32, i32
  }
  func.func @transform_6(%arg0: i32) -> i32 {
    %c0_i32 = arith.constant 0 : i32
    %c0_i32_0 = arith.constant 0 : i32
    return %c0_i32 : i32
  }
  func.func @transform_7(%arg0: i32) -> (i32, i32) {
    %c0_i32 = arith.constant 0 : i32
    %c0_i32_0 = arith.constant 0 : i32
    %c0_i32_1 = arith.constant 0 : i32
    return %c0_i32, %c0_i32_0 : i32, i32
  }
}

</mosaic_0001>

<bundles_post_ra>
// kernel: simple_clip_forward.1
= control target key start
LH: loop header
LB: loop body
LE: loop exit
PB: predicated region body
PF: predicated region fallthrough
CT: control target
= control target key end

     0   :  { %s5966_s0 = inlined_call_operand.vmem [shape: f32[8,3072], index: 0, kind: input, shape index: {}]   ;;  %s5967_s1 = inlined_call_operand.hbm [shape: bf16[3072,512], index: 1, kind: input, shape index: {}]   ;;  %s5968_s2 = inlined_call_operand.hbm [shape: f32[1,512], index: 2, kind: input, shape index: {}]   ;;  %s5969_s3 = inlined_call_operand.vmem [shape: f32[8,768], index: 3, kind: input, shape index: {}]   ;;  %s5970_s4 = inlined_call_operand.hbm [shape: bf16[768,512], index: 4, kind: input, shape index: {}]   ;;  %s5971_s5 = inlined_call_operand.hbm [shape: f32[1,512], index: 5, kind: input, shape index: {}]   ;;  %s5972_s6 = inlined_call_operand.<no memory space> [shape: f32[1], index: 6, kind: input, shape index: {}]   ;;  %s5973_s7 = inlined_call_operand.hbm [shape: f32[8,8], index: 7, kind: output, shape index: {}]  }
   0x1   :  { %12 = sst [smem:[#allocation4]] %s5972_s6 }
   0x2   :  { %13 = vsyncpa [#allocation6], 0 }
   0x3   :  { %15 = vsyncpa [#allocation6 + $0x1], 0 }
   0x4   :  { %16 = vsyncpa [#allocation9], 0 }
   0x5   :  { %17 = vsyncpa [#allocation12], 0 }
   0x6   :  { %18 = vsyncpa [#allocation7], 0  ;;  %s5448_s26 = smov 0   ;;  %s5450_s27 = smov 0  }
   0x7   :  { %s5452_s28 = smov 0   ;;  %s5454_s29 = smov 0  }
   0x8 LB: > { %s5467_s6 = sadd.s32 4294967295, %s5395_s29   ;;  %p70_p0 = scmp.ne.s32.totalorder %s5387_s27, %s5383_s26  ;;  %s5395_s29 = sphi %s5454_s29, %s5992_s29   ;;  %s5391_s28 = sphi %s5452_s28, %s5991_s28   ;;  %s5387_s27 = sphi %s5450_s27, %s5990_s27   ;;  %s5383_s26 = sphi %s5448_s26, %s5989_s26  }
   0x9   : > { %p5974_p1 = scmp.eq.s32.totalorder %s5467_s6, 0  ;;  %p3060_p2 = scmp.ge.s32.totalorder %s5395_s29, 1 }
   0xa   : > { %p207_p3 = scmp.lt.s32.totalorder %s5395_s29, 4  ;;  %s5397_s9 = smov [#allocation8]  }
   0xb   : > { %p5476_p5 = por %p5974_p1, %p70_p0  ;;  %s220_s10 = sshll.u32 %s5397_s9, 4  ;;  %s221_s10 = int_to_ptr.vmem [resolvable:$true] %s220_s10 }
   0xc   : > { %p5480_p6 = pnand %p3060_p2, %p207_p3  ;;  %s5398_s11 = smov [#allocation10]  }
   0xd   : > { %s5977_s30 = scalar_select %p5476_p5, 1, 0 }
   0xe   : > { %s5978_s8 = scalar_select %p5480_p6, 1, 0 }
   0xf   : > { %p4471_p7 = pneg %p5480_p6  ;;  %s233_s12 = sshll.u32 %s5398_s11, 4  ;;  %s5492_s12 = int_to_ptr.vmem [resolvable:$true] %s233_s12 }
  0x10   : > { %s5399_s14 = smov [#allocation11]   ;;  %s5209_s18 = scalar_lea.hbm %s5968_s2, 64 }
  0x11   : > { %p5488_p8 = pnand %p4471_p7, %p5974_p1  ;;  %s5494_s15 = sshll.u32 %s5399_s14, 4  ;;  %s248_s15 = int_to_ptr.vmem [resolvable:$true] %s5494_s15 }
  0x12   : > { %p5210_p9 = scmp.ne.s32.totalorder %s5968_s2, %s5209_s18  ;;  %p5216_p13 = scmp.lt.u32.totalorder %s5209_s18, %s5968_s2 }
  0x13   : > { %p5504_p10 = pneg %p5488_p8 }
  0x15   : > { %p5212_p11 = pnand %p5504_p10, %p5210_p9 }
  0x17   : > { %p5213_p12 = pneg %p5212_p11 }
  0x19   : > { %p5218_p0 = pnand %p5216_p13, %p5213_p12 }
  0x1b   : > { %5221 = shalt.err (!%p5218_p0)
}
  0x1c   : > { %s5222_s24 = scalar_lea.vmem %s221_s10, 64  ;;  %p5230_p4 = scmp.lt.s32.totalorder %s221_s10, %s221_s10 }
  0x1d   : > { %p5223_p2 = scmp.ne.s32.totalorder %s221_s10, %s5222_s24  ;;  %p5231_p1 = scmp.lt.s32.totalorder %s5222_s24, %s5222_s24 }
  0x1f   : > { %p5225_p3 = pnand %p5223_p2, %p5504_p10  ;;  %p5232_p5 = por %p5231_p1, %p5230_p4 }
  0x21   : > { %p5226_p7 = pneg %p5225_p3 }
  0x23   : > { %p5233_p6 = pnand %p5232_p5, %p5226_p7 }
  0x25   : > { %5236 = shalt.err (!%p5233_p6)
}
  0x26   : > { %4474 = dma.hbm_to_vmem [thread:$0]  (!%p5488_p8), %s5968_s2, 64, %s221_s10, [#allocation9]  }
  0x27   : > { %s5237_s14 = scalar_lea.hbm %s5970_s4, 24576 }
  0x28   : > { %p5238_p9 = scmp.ne.s32.totalorder %s5970_s4, %s5237_s14  ;;  %p5244_p4 = scmp.lt.u32.totalorder %s5237_s14, %s5970_s4 }
  0x2a   : > { %p5240_p11 = pnand %p5238_p9, %p5504_p10 }
  0x2c   : > { %p5241_p1 = pneg %p5240_p11 }
  0x2e   : > { %p5246_p5 = pnand %p5244_p4, %p5241_p1 }
  0x30   : > { %5249 = shalt.err (!%p5246_p5)
}
  0x31   : > { %s5250_s10 = scalar_lea.vmem %s5492_s12, 24576  ;;  %p5258_p0 = scmp.lt.s32.totalorder %s5492_s12, %s5492_s12 }
  0x32   : > { %p5251_p6 = scmp.ne.s32.totalorder %s5492_s12, %s5250_s10  ;;  %p5259_p2 = scmp.lt.s32.totalorder %s5250_s10, %s5250_s10 }
  0x34   : > { %p5253_p12 = pnand %p5251_p6, %p5504_p10  ;;  %p5260_p3 = por %p5259_p2, %p5258_p0 }
  0x36   : > { %p5254_p13 = pneg %p5253_p12 }
  0x38   : > { %p5261_p7 = pnand %p5260_p3, %p5254_p13 }
  0x3a   : > { %5264 = shalt.err (!%p5261_p7)
}
  0x3b   : > { %s5400_s20 = smov 256   ;;  %s5401_s22 = smov 16  }
  0x3c   : > { %4477 = dma.hbm_to_vmem [thread:$0]  (!%p5488_p8), %s5970_s4, 24576, %s5492_s12, [#allocation9], %s5400_s20, %s5400_s20, %s5401_s22  }
  0x3d   : > { %s5265_s9 = scalar_lea.hbm %s5971_s5, 64 }
  0x3e   : > { %p5266_p9 = scmp.ne.s32.totalorder %s5971_s5, %s5265_s9  ;;  %p5272_p4 = scmp.lt.u32.totalorder %s5265_s9, %s5971_s5 }
  0x40   : > { %p5268_p11 = pnand %p5266_p9, %p5504_p10 }
  0x42   : > { %p5269_p1 = pneg %p5268_p11 }
  0x44   : > { %p5274_p5 = pnand %p5272_p4, %p5269_p1 }
  0x46   : > { %5277 = shalt.err (!%p5274_p5)
}
  0x47   : > { %s5278_s18 = scalar_lea.vmem %s248_s15, 64  ;;  %p5286_p0 = scmp.lt.s32.totalorder %s248_s15, %s248_s15 }
  0x48   : > { %p5279_p6 = scmp.ne.s32.totalorder %s248_s15, %s5278_s18  ;;  %p5287_p2 = scmp.lt.s32.totalorder %s5278_s18, %s5278_s18 }
  0x4a   : > { %p5281_p12 = pnand %p5279_p6, %p5504_p10  ;;  %p5288_p3 = por %p5287_p2, %p5286_p0 }
  0x4c   : > { %p5282_p13 = pneg %p5281_p12 }
  0x4e   : > { %p5289_p7 = pnand %p5288_p3, %p5282_p13 }
  0x50   : > { %5292 = shalt.err (!%p5289_p7)
}
  0x51   : > { %4480 = dma.hbm_to_vmem [thread:$0]  (!%p5488_p8), %s5971_s5, 64, %s248_s15, [#allocation12]  }
  0x52   : > { %s5566_s21 = sadd.s32 1, %s5395_s29   ;;  %s57_s23 = sadd.s32 1, %s5391_s28 }
  0x53   : > { %s54_s10 = ssub.s32 %s5395_s29, %s5566_s21  ;;  %p64_p9 = scmp.ne.s32.totalorder %s5391_s28, %s5387_s27 }
  0x54   : > { %p55_p10 = scmp.eq.s32.totalorder %s54_s10, 0  ;;  %p65_p11 = scmp.eq.s32.totalorder %s5395_s29, 0 }
  0x55   : > { %p4488_p1 = scmp.lt.s32.totalorder %s5395_s29, 3  ;;  %s270_s24 = sand.u32 1, %s5391_s28  }
  0x56   : > { %s5576_s13 = scalar_select %p55_p10, %s5391_s28, %s57_s23  }
  0x57   : > { %p66_p4 = por %p65_p11, %p64_p9  ;;  %s3065_s25 = sshll.u32 %s270_s24, 11 }
  0x58   : > { %s3083_s26 = sshll.u32 %s5395_s29, 15  ;;  %s274_s15 = scalar_lea.vmem [#allocation5], %s3065_s25 }
  0x59   : > { %s5583_s14 = scalar_lea.hbm %s5967_s1, %s3083_s26  ;;  %s282_s16 = sshll.u32 %s274_s15, 4  ;;  %s5585_s16 = int_to_ptr.vmem [resolvable:$true] %s282_s16 }
  0x5a   : > { %p5587_p8 = pnand %p4488_p1, %p66_p4  ;;  %s5591_s29 = scalar_lea.sflag [#allocation6], %s270_s24 }
  0x5b   : > { %s5293_s18 = scalar_lea.hbm %s5583_s14, 32768  ;;  %s5298_s10 = scalar_lea.hbm %s5967_s1, 98304 }
  0x5c   : > { %p5294_p5 = scmp.ne.s32.totalorder %s5583_s14, %s5293_s18  ;;  %p5295_p6 = pneg %p5587_p8 }
  0x5d   : > { %p5299_p0 = scmp.lt.u32.totalorder %s5583_s14, %s5967_s1  ;;  %p5300_p2 = scmp.lt.u32.totalorder %s5298_s10, %s5293_s18 }
  0x5e   : > { %p5296_p12 = pnand %p5295_p6, %p5294_p5  ;;  %p5302_p7 = scmp.lt.u32.totalorder %s5293_s18, %s5583_s14 }
  0x5f   : > { %p5301_p3 = por %p5300_p2, %p5299_p0 }
  0x60   : > { %p5297_p13 = pneg %p5296_p12 }
  0x61   : > { %p5303_p10 = por %p5302_p7, %p5301_p3 }
  0x63   : > { %p5304_p9 = pnand %p5303_p10, %p5297_p13 }
  0x65   : > { %5307 = shalt.err (!%p5304_p9)
}
  0x66   : > { %s5308_s24 = scalar_lea.vmem %s5585_s16, 32768  ;;  %s5402_s26 = smov [#allocation5]  }
  0x67   : > { %p5309_p11 = scmp.ne.s32.totalorder %s5585_s16, %s5308_s24  ;;  %s5313_s9 = sshll.u32 %s5402_s26, 4  ;;  %s5314_s9 = int_to_ptr.vmem [resolvable:$false] %s5313_s9 }
  0x68   : > { %s5315_s11 = scalar_lea.vmem %s5314_s9, 65536  ;;  %p5316_p5 = scmp.lt.s32.totalorder %s5585_s16, %s5314_s9 }
  0x69   : > { %p5311_p1 = pnand %p5309_p11, %p5295_p6  ;;  %p5317_p12 = scmp.lt.s32.totalorder %s5315_s11, %s5308_s24 }
  0x6b   : > { %p5312_p4 = pneg %p5311_p1  ;;  %p5318_p0 = por %p5317_p12, %p5316_p5 }
  0x6d   : > { %p5319_p2 = pnand %p5318_p0, %p5312_p4 }
  0x6f   : > { %5322 = shalt.err (!%p5319_p2)
}
  0x70   : > { %4484 = dma.hbm_to_vmem [thread:$0]  (!%p5587_p8), %s5583_s14, 32768, %s5585_s16, %s5591_s29, %s5400_s20, %s5400_s20, %s5401_s22  }
  0x71   : > { %p5982_p6 = scmp.ne.s32.totalorder %s5978_s8, 0 }
  0x72   : > { %s296_s15 = sand.u32 (!%p5982_p6), 1, %s5387_s27   ;;  %p5983_p13 = scmp.ne.s32.totalorder (!%p5982_p6), %s5977_s30, 0 }
  0x73   : > { %294 = sbr.rel (%p5982_p6) target bundleno = 1596 (0x63c), region = 48  ;;  %s3070_s18 = sshll.u32 (!%p5982_p6), %s296_s15, 11 }
  0x74   : > { %s297_s12 = scalar_lea.sflag (!%p5982_p6), [#allocation6], %s296_s15  ;;  %s5625_s19 = scalar_lea.vmem (!%p5982_p6), [#allocation5], %s3070_s18 }
  0x7a   : > { %5366 = dma.done.wait (%p5983_p13), %s297_s12, 32768  }
  0x7b   : > { %5368 = vsyncadd (%p5983_p13), %s297_s12, 4294934528  ;;  %p5984_p3 = scmp.eq.s32.totalorder %s5467_s6, 0 }
  0x7d   : > { %5370 = dma.done.wait (%p5984_p3), [#allocation9], 24640   ;;  %p5985_p8 = pmov %p5984_p3 }
  0x7e   : > { %p5986_p7 = pmov %p5984_p3 }
  0x7f   : > { %5372 = vsyncadd (%p5985_p8), [#allocation9], 4294942656 }
  0x80   : > { %5374 = dma.done.wait (%p5986_p7), [#allocation12], 64   ;;  %p5987_p10 = pmov %p5984_p3 }
  0x81   : > { %s3074_s8 = sshll.u32 %s5467_s6, 3  ;;  %p5988_p11 = scmp.ne.s32.totalorder %s5467_s6, 0 }
  0x82   : > { %5376 = vsyncadd (%p5987_p10), [#allocation12], 4294967232  ;;  %p344_p9 = scmp.lt.s32.totalorder %s3074_s8, 23  ;;  %v4533_v0 = vld [vmem:[#allocation10 + $0x4] ss:$16 sps:$4 sm:$0xff] (!%p5988_p11)   ;;  %v5403_v1 = vmov (!%p5988_p11), 0.0  }
  0x83   : > { %353 = sbr.rel (%p5988_p11) target bundleno = 706 (0x2c2), region = 68  ;;  %354 = vst [vmem:[#allocation2] sm:$0xff] (!%p5988_p11), %v5403_v1  ;;  %355 = vst [vmem:[#allocation2 + $0x8] sm:$0xff] (!%p5988_p11), %v5403_v1  ;;  %v4535_v2 = vld [vmem:[#allocation10 + $0xc] ss:$16 sps:$4 sm:$0xff] (!%p5988_p11)   ;;  %3085 = vmatprep.subr.bf16.mxu0 (!%p5988_p11), %v4533_v0  ;;  %v359_v47 = vld [vmem:[%s5969_s3 + $0x8] sm:$0xff] (!%p5988_p11) }
  0x84   : > { %s5994_s8 = smov (!%p344_p9, %s3074_s8), 23  ;;  %356 = vst [vmem:[#allocation2 + $0x10] sm:$0xff] (!%p5988_p11), %v5403_v1  ;;  %357 = vst [vmem:[#allocation2 + $0x18] sm:$0xff] (!%p5988_p11), %v5403_v1  ;;  %v4537_v3 = vld [vmem:[#allocation10] ss:$16 sps:$4 sm:$0xff] (!%p5988_p11)   ;;  %3277 = vmatprep.subr.bf16.mxu1 (!%p5988_p11), %v4535_v2  ;;  %1026 = vmatprep.mubr.f32.mxu0 (!%p5988_p11), %v359_v47 }
  0x85   : > { %s3075_s20 = sshll.u32 %s5994_s8, 3  ;;  %v4538_v4 = vld [vmem:[#allocation10 + $0x8] ss:$16 sps:$4 sm:$0xff] (!%p5988_p11)   ;;  %v4539_v5 = vld [vmem:[#allocation10 + $0x24] ss:$16 sps:$4 sm:$0xff] (!%p5988_p11)   ;;  %3087 = vmatpush1.bf16.msra.mxu0 (!%p5988_p11), %v4537_v3  ;;  %1239 = vmatprep.mubr.f32.mxu1 (!%p5988_p11), %v359_v47 }
  0x86   : > { %s5643_s14 = scalar_lea.vmem %s5966_s0, %s3075_s20  ;;  %3279 = vmatpush1.bf16.msra.mxu1 (!%p5988_p11), %v4538_v4  ;;  %v4541_v6 = vld [vmem:[#allocation10 + $0x2c] ss:$16 sps:$4 sm:$0xff] (!%p5988_p11)   ;;  %v4543_v7 = vld [vmem:[#allocation10 + $0x20] ss:$16 sps:$4 sm:$0xff] (!%p5988_p11)   ;;  %3089 = vmatprep.subr.bf16.mxu0 (!%p5988_p11), %v4539_v5  ;;  %v4544_v8 = vld [vmem:[#allocation10 + $0x28] ss:$16 sps:$4 sm:$0xff] (!%p5988_p11)  }
  0x87   : > { %3281 = vmatprep.subr.bf16.mxu1 (!%p5988_p11), %v4541_v6  ;;  %v4545_v9 = vld [vmem:[#allocation10 + $0x44] ss:$16 sps:$4 sm:$0xff] (!%p5988_p11)   ;;  %v4547_v10 = vld [vmem:[#allocation10 + $0x4c] ss:$16 sps:$4 sm:$0xff] (!%p5988_p11)   ;;  %v4549_v11 = vld [vmem:[#allocation10 + $0x40] ss:$16 sps:$4 sm:$0xff] (!%p5988_p11)  }
  0x88   : > { %v4550_v12 = vld [vmem:[#allocation10 + $0x48] ss:$16 sps:$4 sm:$0xff] (!%p5988_p11)   ;;  %v4551_v13 = vld [vmem:[#allocation10 + $0x64] ss:$16 sps:$4 sm:$0xff] (!%p5988_p11)   ;;  %v4553_v14 = vld [vmem:[#allocation10 + $0x6c] ss:$16 sps:$4 sm:$0xff] (!%p5988_p11)  }
  0x89   : > { %3091 = vmatpush1.bf16.msra.mxu0 (!%p5988_p11), %v4543_v7  ;;  %v4555_v15 = vld [vmem:[#allocation10 + $0x60] ss:$16 sps:$4 sm:$0xff] (!%p5988_p11)   ;;  %v4556_v16 = vld [vmem:[#allocation10 + $0x68] ss:$16 sps:$4 sm:$0xff] (!%p5988_p11)   ;;  %v4557_v17 = vld [vmem:[#allocation10 + $0x84] ss:$16 sps:$4 sm:$0xff] (!%p5988_p11)  }
  0x8a   : > { %3283 = vmatpush1.bf16.msra.mxu1 %v4544_v8  ;;  %3093 = vmatprep.subr.bf16.mxu0 %v4545_v9  ;;  %v4559_v18 = vld [vmem:[#allocation10 + $0x8c] ss:$16 sps:$4 sm:$0xff]   ;;  %v4561_v19 = vld [vmem:[#allocation10 + $0x80] ss:$16 sps:$4 sm:$0xff]   ;;  %v4562_v20 = vld [vmem:[#allocation10 + $0x88] ss:$16 sps:$4 sm:$0xff]  }
  0x8b   : > { %3285 = vmatprep.subr.bf16.mxu1 %v4547_v10  ;;  %v4563_v21 = vld [vmem:[#allocation10 + $0xa4] ss:$16 sps:$4 sm:$0xff]   ;;  %v4565_v22 = vld [vmem:[#allocation10 + $0xac] ss:$16 sps:$4 sm:$0xff]   ;;  %v4567_v23 = vld [vmem:[#allocation10 + $0xa0] ss:$16 sps:$4 sm:$0xff]  }
  0x8c   : > { %v4568_v24 = vld [vmem:[#allocation10 + $0xa8] ss:$16 sps:$4 sm:$0xff]   ;;  %v4569_v25 = vld [vmem:[#allocation10 + $0xc4] ss:$16 sps:$4 sm:$0xff]   ;;  %v4571_v26 = vld [vmem:[#allocation10 + $0xcc] ss:$16 sps:$4 sm:$0xff]  }
  0x8d   : > { %3095 = vmatpush1.bf16.msra.mxu0 %v4549_v11  ;;  %v4573_v27 = vld [vmem:[#allocation10 + $0xc0] ss:$16 sps:$4 sm:$0xff]   ;;  %v4574_v28 = vld [vmem:[#allocation10 + $0xc8] ss:$16 sps:$4 sm:$0xff]   ;;  %v4575_v29 = vld [vmem:[#allocation10 + $0xe4] ss:$16 sps:$4 sm:$0xff]  }
  0x8e   : > { %3287 = vmatpush1.bf16.msra.mxu1 %v4550_v12  ;;  %3097 = vmatprep.subr.bf16.mxu0 %v4551_v13  ;;  %v4577_v30 = vld [vmem:[#allocation10 + $0xec] ss:$16 sps:$4 sm:$0xff]   ;;  %v4579_v31 = vld [vmem:[#allocation10 + $0xe0] ss:$16 sps:$4 sm:$0xff]   ;;  %v4580_v32 = vld [vmem:[#allocation10 + $0xe8] ss:$16 sps:$4 sm:$0xff]  }
  0x8f   : > { %3289 = vmatprep.subr.bf16.mxu1 %v4553_v14  ;;  %v4581_v33 = vld [vmem:[#allocation10 + $0x104] ss:$16 sps:$4 sm:$0xff]   ;;  %v4583_v34 = vld [vmem:[#allocation10 + $0x10c] ss:$16 sps:$4 sm:$0xff]   ;;  %v4585_v35 = vld [vmem:[#allocation10 + $0x100] ss:$16 sps:$4 sm:$0xff]  }
  0x90   : > { %v4586_v36 = vld [vmem:[#allocation10 + $0x108] ss:$16 sps:$4 sm:$0xff]   ;;  %v4587_v37 = vld [vmem:[#allocation10 + $0x124] ss:$16 sps:$4 sm:$0xff]   ;;  %v4589_v38 = vld [vmem:[#allocation10 + $0x12c] ss:$16 sps:$4 sm:$0xff]  }
  0x91   : > { %3099 = vmatpush1.bf16.msra.mxu0 %v4555_v15  ;;  %v4591_v39 = vld [vmem:[#allocation10 + $0x120] ss:$16 sps:$4 sm:$0xff]   ;;  %v4592_v40 = vld [vmem:[#allocation10 + $0x128] ss:$16 sps:$4 sm:$0xff]   ;;  %v4593_v41 = vld [vmem:[#allocation10 + $0x144] ss:$16 sps:$4 sm:$0xff]  }
  0x92   : > { %3291 = vmatpush1.bf16.msra.mxu1 %v4556_v16  ;;  %3101 = vmatprep.subr.bf16.mxu0 %v4557_v17  ;;  %v4595_v42 = vld [vmem:[#allocation10 + $0x14c] ss:$16 sps:$4 sm:$0xff]   ;;  %v4597_v43 = vld [vmem:[#allocation10 + $0x140] ss:$16 sps:$4 sm:$0xff]   ;;  %v4598_v44 = vld [vmem:[#allocation10 + $0x148] ss:$16 sps:$4 sm:$0xff]  }
  0x93   : > { %3293 = vmatprep.subr.bf16.mxu1 %v4559_v18  ;;  %v4599_v45 = vld [vmem:[#allocation10 + $0x164] ss:$16 sps:$4 sm:$0xff]   ;;  %v4601_v46 = vld [vmem:[#allocation10 + $0x16c] ss:$16 sps:$4 sm:$0xff]   ;;  %v4603_v48 = vld [vmem:[#allocation10 + $0x160] ss:$16 sps:$4 sm:$0xff]  }
  0x94   : > { %v4604_v49 = vld [vmem:[#allocation10 + $0x168] ss:$16 sps:$4 sm:$0xff]   ;;  %v4605_v50 = vld [vmem:[#allocation10 + $0x184] ss:$16 sps:$4 sm:$0xff]   ;;  %v4607_v51 = vld [vmem:[#allocation10 + $0x18c] ss:$16 sps:$4 sm:$0xff]  }
  0x95   : > { %3103 = vmatpush1.bf16.msra.mxu0 %v4561_v19  ;;  %v4609_v52 = vld [vmem:[#allocation10 + $0x180] ss:$16 sps:$4 sm:$0xff]   ;;  %v4610_v53 = vld [vmem:[#allocation10 + $0x188] ss:$16 sps:$4 sm:$0xff]   ;;  %v4611_v54 = vld [vmem:[#allocation10 + $0x1a4] ss:$16 sps:$4 sm:$0xff]  }
  0x96   : > { %3295 = vmatpush1.bf16.msra.mxu1 %v4562_v20  ;;  %3105 = vmatprep.subr.bf16.mxu0 %v4563_v21  ;;  %v4613_v55 = vld [vmem:[#allocation10 + $0x1ac] ss:$16 sps:$4 sm:$0xff]   ;;  %v4615_v56 = vld [vmem:[#allocation10 + $0x1a0] ss:$16 sps:$4 sm:$0xff]   ;;  %v4616_v57 = vld [vmem:[#allocation10 + $0x1a8] ss:$16 sps:$4 sm:$0xff]  }
  0x97   : > { %3297 = vmatprep.subr.bf16.mxu1 %v4565_v22  ;;  %v4617_v58 = vld [vmem:[#allocation10 + $0x1c4] ss:$16 sps:$4 sm:$0xff]   ;;  %v4619_v59 = vld [vmem:[#allocation10 + $0x1cc] ss:$16 sps:$4 sm:$0xff]   ;;  %v4621_v60 = vld [vmem:[#allocation10 + $0x1c0] ss:$16 sps:$4 sm:$0xff]  }
  0x98   : > { %v4622_v61 = vld [vmem:[#allocation10 + $0x1c8] ss:$16 sps:$4 sm:$0xff]   ;;  %v4623_v62 = vld [vmem:[#allocation10 + $0x1e4] ss:$16 sps:$4 sm:$0xff]   ;;  %v4625_v63 = vld [vmem:[#allocation10 + $0x1ec] ss:$16 sps:$4 sm:$0xff]  }
  0x99   : > { %3107 = vmatpush1.bf16.msra.mxu0 %v4567_v23  ;;  %v4627_v0 = vld [vmem:[#allocation10 + $0x1e0] ss:$16 sps:$4 sm:$0xff]   ;;  %v4628_v1 = vld [vmem:[#allocation10 + $0x1e8] ss:$16 sps:$4 sm:$0xff]   ;;  %v4629_v2 = vld [vmem:[#allocation10 + $0x204] ss:$16 sps:$4 sm:$0xff]  }
  0x9a   : > { %3299 = vmatpush1.bf16.msra.mxu1 %v4568_v24  ;;  %3109 = vmatprep.subr.bf16.mxu0 %v4569_v25  ;;  %v4632_v3 = vld [vmem:[#allocation10 + $0x20c] ss:$16 sps:$4 sm:$0xff]   ;;  %v4631_v4 = vld [vmem:[#allocation10 + $0x200] ss:$16 sps:$4 sm:$0xff]   ;;  %v4634_v5 = vld [vmem:[#allocation10 + $0x208] ss:$16 sps:$4 sm:$0xff]  }
  0x9b   : > { %3301 = vmatprep.subr.bf16.mxu1 %v4571_v26  ;;  %v358_v6 = vld [vmem:[%s5969_s3] sm:$0xff]  ;;  %v4635_v7 = vld [vmem:[#allocation10 + $0x224] ss:$16 sps:$4 sm:$0xff]   ;;  %v4640_v10 = vld [vmem:[#allocation10 + $0x228] ss:$16 sps:$4 sm:$0xff]  }
  0x9c   : > { %v4638_v8 = vld [vmem:[#allocation10 + $0x22c] ss:$16 sps:$4 sm:$0xff]   ;;  %v4637_v9 = vld [vmem:[#allocation10 + $0x220] ss:$16 sps:$4 sm:$0xff]   ;;  %v4641_v11 = vld [vmem:[#allocation10 + $0x244] ss:$16 sps:$4 sm:$0xff]  }
  0x9d   : > { %3111 = vmatpush1.bf16.msra.mxu0 %v4573_v27  ;;  %v4644_v12 = vld [vmem:[#allocation10 + $0x24c] ss:$16 sps:$4 sm:$0xff]   ;;  %v4643_v13 = vld [vmem:[#allocation10 + $0x240] ss:$16 sps:$4 sm:$0xff]   ;;  %v4646_v14 = vld [vmem:[#allocation10 + $0x248] ss:$16 sps:$4 sm:$0xff]  }
  0x9e   : > { %3303 = vmatpush1.bf16.msra.mxu1 %v4574_v28  ;;  %3113 = vmatprep.subr.bf16.mxu0 %v4575_v29  ;;  %v4647_v15 = vld [vmem:[#allocation10 + $0x264] ss:$16 sps:$4 sm:$0xff]   ;;  %v4650_v16 = vld [vmem:[#allocation10 + $0x26c] ss:$16 sps:$4 sm:$0xff]   ;;  %v4649_v17 = vld [vmem:[#allocation10 + $0x260] ss:$16 sps:$4 sm:$0xff]  }
  0x9f   : > { %3305 = vmatprep.subr.bf16.mxu1 %v4577_v30  ;;  %v4652_v18 = vld [vmem:[#allocation10 + $0x268] ss:$16 sps:$4 sm:$0xff]   ;;  %v4653_v19 = vld [vmem:[#allocation10 + $0x284] ss:$16 sps:$4 sm:$0xff]   ;;  %v4656_v20 = vld [vmem:[#allocation10 + $0x28c] ss:$16 sps:$4 sm:$0xff]  }
  0xa0   : > { %v4655_v21 = vld [vmem:[#allocation10 + $0x280] ss:$16 sps:$4 sm:$0xff]   ;;  %v4658_v22 = vld [vmem:[#allocation10 + $0x288] ss:$16 sps:$4 sm:$0xff]   ;;  %v4659_v23 = vld [vmem:[#allocation10 + $0x2a4] ss:$16 sps:$4 sm:$0xff]  }
  0xa1   : > { %3115 = vmatpush1.bf16.msra.mxu0 %v4579_v31  ;;  %v4662_v24 = vld [vmem:[#allocation10 + $0x2ac] ss:$16 sps:$4 sm:$0xff]   ;;  %v4661_v25 = vld [vmem:[#allocation10 + $0x2a0] ss:$16 sps:$4 sm:$0xff]   ;;  %v4664_v26 = vld [vmem:[#allocation10 + $0x2a8] ss:$16 sps:$4 sm:$0xff]  }
  0xa2   : > { %3307 = vmatpush1.bf16.msra.mxu1 %v4580_v32  ;;  %3117 = vmatprep.subr.bf16.mxu0 %v4581_v33  ;;  %v4665_v27 = vld [vmem:[#allocation10 + $0x2c4] ss:$16 sps:$4 sm:$0xff]   ;;  %v4668_v28 = vld [vmem:[#allocation10 + $0x2cc] ss:$16 sps:$4 sm:$0xff]   ;;  %v4667_v30 = vld [vmem:[#allocation10 + $0x2c0] ss:$16 sps:$4 sm:$0xff]  }
  0xa3   : > { %3309 = vmatprep.subr.bf16.mxu1 %v4583_v34  ;;  %v361_v29 = vld [vmem:[%s5969_s3 + $0x18] sm:$0xff]  ;;  %v4674_v33 = vld [vmem:[#allocation10 + $0x2ec] ss:$16 sps:$4 sm:$0xff]   ;;  %v4673_v34 = vld [vmem:[#allocation10 + $0x2e0] ss:$16 sps:$4 sm:$0xff]  }
  0xa4   : > { %v4670_v31 = vld [vmem:[#allocation10 + $0x2c8] ss:$16 sps:$4 sm:$0xff]   ;;  %v4671_v32 = vld [vmem:[#allocation10 + $0x2e4] ss:$16 sps:$4 sm:$0xff]  }
  0xa5   : > { %3119 = vmatpush1.bf16.msra.mxu0 %v4585_v35  ;;  %v4676_v35 = vld [vmem:[#allocation10 + $0x2e8] ss:$16 sps:$4 sm:$0xff]  }
  0xa6   : > { %3311 = vmatpush1.bf16.msra.mxu1 %v4586_v36  ;;  %3121 = vmatprep.subr.bf16.mxu0 %v4587_v37  ;;  %v4677_v36 = vld [vmem:[#allocation10 + $0x304] ss:$16 sps:$4 sm:$0xff]   ;;  %v4680_v37 = vld [vmem:[#allocation10 + $0x30c] ss:$16 sps:$4 sm:$0xff]   ;;  %v4694_v47 = vld [vmem:[#allocation10 + $0x348] ss:$16 sps:$4 sm:$0xff]  }
  0xa7   : > { %3313 = vmatprep.subr.bf16.mxu1 %v4589_v38  ;;  %v4679_v38 = vld [vmem:[#allocation10 + $0x300] ss:$16 sps:$4 sm:$0xff]  }
  0xa9   : > { %3123 = vmatpush1.bf16.msra.mxu0 %v4591_v39  ;;  %v4682_v39 = vld [vmem:[#allocation10 + $0x308] ss:$16 sps:$4 sm:$0xff]  }
  0xaa   : > { %3315 = vmatpush1.bf16.msra.mxu1 %v4592_v40  ;;  %3125 = vmatprep.subr.bf16.mxu0 %v4593_v41  ;;  %v4683_v40 = vld [vmem:[#allocation10 + $0x324] ss:$16 sps:$4 sm:$0xff]   ;;  %v4686_v41 = vld [vmem:[#allocation10 + $0x32c] ss:$16 sps:$4 sm:$0xff]  }
  0xab   : > { %3317 = vmatprep.subr.bf16.mxu1 %v4595_v42  ;;  %v4685_v42 = vld [vmem:[#allocation10 + $0x320] ss:$16 sps:$4 sm:$0xff]  }
  0xad   : > { %3127 = vmatpush1.bf16.msra.mxu0 %v4597_v43  ;;  %v4688_v43 = vld [vmem:[#allocation10 + $0x328] ss:$16 sps:$4 sm:$0xff]  }
  0xae   : > { %3319 = vmatpush1.bf16.msra.mxu1 %v4598_v44  ;;  %3129 = vmatprep.subr.bf16.mxu0 %v4599_v45  ;;  %v4689_v44 = vld [vmem:[#allocation10 + $0x344] ss:$16 sps:$4 sm:$0xff]   ;;  %v4692_v45 = vld [vmem:[#allocation10 + $0x34c] ss:$16 sps:$4 sm:$0xff]  }
  0xaf   : > { %3321 = vmatprep.subr.bf16.mxu1 %v4601_v46  ;;  %v4691_v46 = vld [vmem:[#allocation10 + $0x340] ss:$16 sps:$4 sm:$0xff]  }
  0xb1   : > { %3131 = vmatpush1.bf16.msra.mxu0 %v4603_v48  ;;  %v4695_v48 = vld [vmem:[#allocation10 + $0x364] ss:$16 sps:$4 sm:$0xff]  }
  0xb2   : > { %3323 = vmatpush1.bf16.msra.mxu1 %v4604_v49  ;;  %3133 = vmatprep.subr.bf16.mxu0 %v4605_v50  ;;  %v4698_v49 = vld [vmem:[#allocation10 + $0x36c] ss:$16 sps:$4 sm:$0xff]   ;;  %v4697_v50 = vld [vmem:[#allocation10 + $0x360] ss:$16 sps:$4 sm:$0xff]  }
  0xb3   : > { %3325 = vmatprep.subr.bf16.mxu1 %v4607_v51  ;;  %v4700_v51 = vld [vmem:[#allocation10 + $0x368] ss:$16 sps:$4 sm:$0xff]  }
  0xb5   : > { %3135 = vmatpush1.bf16.msra.mxu0 %v4609_v52  ;;  %v4701_v52 = vld [vmem:[#allocation10 + $0x384] ss:$16 sps:$4 sm:$0xff]  }
  0xb6   : > { %3327 = vmatpush1.bf16.msra.mxu1 %v4610_v53  ;;  %3137 = vmatprep.subr.bf16.mxu0 %v4611_v54  ;;  %v4704_v53 = vld [vmem:[#allocation10 + $0x38c] ss:$16 sps:$4 sm:$0xff]   ;;  %v4703_v54 = vld [vmem:[#allocation10 + $0x380] ss:$16 sps:$4 sm:$0xff]  }
  0xb7   : > { %3329 = vmatprep.subr.bf16.mxu1 %v4613_v55  ;;  %v4706_v55 = vld [vmem:[#allocation10 + $0x388] ss:$16 sps:$4 sm:$0xff]  }
  0xb9   : > { %3139 = vmatpush1.bf16.msra.mxu0 %v4615_v56  ;;  %v4707_v56 = vld [vmem:[#allocation10 + $0x3a4] ss:$16 sps:$4 sm:$0xff]  }
  0xba   : > { %3331 = vmatpush1.bf16.msra.mxu1 %v4616_v57  ;;  %3141 = vmatprep.subr.bf16.mxu0 %v4617_v58  ;;  %v4710_v57 = vld [vmem:[#allocation10 + $0x3ac] ss:$16 sps:$4 sm:$0xff]   ;;  %v4709_v58 = vld [vmem:[#allocation10 + $0x3a0] ss:$16 sps:$4 sm:$0xff]  }
  0xbb   : > { %3333 = vmatprep.subr.bf16.mxu1 %v4619_v59  ;;  %v4712_v59 = vld [vmem:[#allocation10 + $0x3a8] ss:$16 sps:$4 sm:$0xff]  }
  0xbd   : > { %3143 = vmatpush1.bf16.msra.mxu0 %v4621_v60  ;;  %v4713_v60 = vld [vmem:[#allocation10 + $0x3c4] ss:$16 sps:$4 sm:$0xff]  }
  0xbe   : > { %3335 = vmatpush1.bf16.msra.mxu1 %v4622_v61  ;;  %3145 = vmatprep.subr.bf16.mxu0 %v4623_v62  ;;  %v4716_v61 = vld [vmem:[#allocation10 + $0x3cc] ss:$16 sps:$4 sm:$0xff]   ;;  %v4715_v62 = vld [vmem:[#allocation10 + $0x3c0] ss:$16 sps:$4 sm:$0xff]  }
  0xbf   : > { %3337 = vmatprep.subr.bf16.mxu1 %v4625_v63  ;;  %v4718_v63 = vld [vmem:[#allocation10 + $0x3c8] ss:$16 sps:$4 sm:$0xff]  }
  0xc1   : > { %3147 = vmatpush1.bf16.msra.mxu0 %v4627_v0  ;;  %v4719_v0 = vld [vmem:[#allocation10 + $0x3e4] ss:$16 sps:$4 sm:$0xff]  }
  0xc2   : > { %3339 = vmatpush1.bf16.msra.mxu1 %v4628_v1  ;;  %3149 = vmatprep.subr.bf16.mxu0 %v4629_v2  ;;  %v4722_v1 = vld [vmem:[#allocation10 + $0x3ec] ss:$16 sps:$4 sm:$0xff]   ;;  %v4721_v2 = vld [vmem:[#allocation10 + $0x3e0] ss:$16 sps:$4 sm:$0xff]  }
  0xc3   : > { %3341 = vmatprep.subr.bf16.mxu1 %v4632_v3  ;;  %v4724_v3 = vld [vmem:[#allocation10 + $0x3e8] ss:$16 sps:$4 sm:$0xff]  }
  0xc4   : > { %1027 = vmatmul.mubr.f32.vlgmr.msra.gmra.mrb[0].mxu0 %v358_v6 }
  0xc5   : > { %1240 = vmatmul.mubr.f32.vlgmr.msra.gmra.mrb[0].mxu1 %v358_v6  ;;  %3151 = vmatpush1.bf16.msra.mxu0 %v4631_v4  ;;  %v4725_v4 = vld [vmem:[#allocation10 + $0x404] ss:$16 sps:$4 sm:$0xff]   ;;  %v4727_v6 = vld [vmem:[#allocation10 + $0x400] ss:$16 sps:$4 sm:$0xff]  }
  0xc6   : > { %3343 = vmatpush1.bf16.msra.mxu1 %v4634_v5  ;;  %3153 = vmatprep.subr.bf16.mxu0 %v4635_v7  ;;  %v4728_v5 = vld [vmem:[#allocation10 + $0x40c] ss:$16 sps:$4 sm:$0xff]   ;;  %v4730_v7 = vld [vmem:[#allocation10 + $0x408] ss:$16 sps:$4 sm:$0xff]  }
  0xc7   : > { %3345 = vmatprep.subr.bf16.mxu1 %v4638_v8  ;;  %1097 = vmatprep.mubr.f32.mxu0 %v361_v29  ;;  %v360_v8 = vld [vmem:[%s5969_s3 + $0x10] sm:$0xff] }
  0xc8   : > { %1310 = vmatprep.mubr.f32.mxu1 %v361_v29  ;;  %v4760_v29 = vld [vmem:[#allocation10 + $0x4a8] ss:$16 sps:$4 sm:$0xff]  }
  0xc9   : > { %3155 = vmatpush1.bf16.msra.mxu0 %v4637_v9  ;;  %v4731_v9 = vld [vmem:[#allocation10 + $0x424] ss:$16 sps:$4 sm:$0xff]  }
  0xca   : > { %3347 = vmatpush1.bf16.msra.mxu1 %v4640_v10  ;;  %3157 = vmatprep.subr.bf16.mxu0 %v4641_v11  ;;  %v4734_v10 = vld [vmem:[#allocation10 + $0x42c] ss:$16 sps:$4 sm:$0xff]   ;;  %v363_v11 = vld [vmem:[%s5969_s3 + $0x28] sm:$0xff] }
  0xcb   : > { %3349 = vmatprep.subr.bf16.mxu1 %v4644_v12  ;;  %v4733_v12 = vld [vmem:[#allocation10 + $0x420] ss:$16 sps:$4 sm:$0xff]  }
  0xcd   : > { %3159 = vmatpush1.bf16.msra.mxu0 %v4643_v13  ;;  %v4736_v13 = vld [vmem:[#allocation10 + $0x428] ss:$16 sps:$4 sm:$0xff]  }
  0xce   : > { %3351 = vmatpush1.bf16.msra.mxu1 %v4646_v14  ;;  %3161 = vmatprep.subr.bf16.mxu0 %v4647_v15  ;;  %v4737_v14 = vld [vmem:[#allocation10 + $0x444] ss:$16 sps:$4 sm:$0xff]   ;;  %v4740_v15 = vld [vmem:[#allocation10 + $0x44c] ss:$16 sps:$4 sm:$0xff]  }
  0xcf   : > { %3353 = vmatprep.subr.bf16.mxu1 %v4650_v16  ;;  %v4739_v16 = vld [vmem:[#allocation10 + $0x440] ss:$16 sps:$4 sm:$0xff]  }
  0xd1   : > { %3163 = vmatpush1.bf16.msra.mxu0 %v4649_v17  ;;  %v4742_v17 = vld [vmem:[#allocation10 + $0x448] ss:$16 sps:$4 sm:$0xff]  }
  0xd2   : > { %3355 = vmatpush1.bf16.msra.mxu1 %v4652_v18  ;;  %3165 = vmatprep.subr.bf16.mxu0 %v4653_v19  ;;  %v4743_v18 = vld [vmem:[#allocation10 + $0x464] ss:$16 sps:$4 sm:$0xff]   ;;  %v4746_v19 = vld [vmem:[#allocation10 + $0x46c] ss:$16 sps:$4 sm:$0xff]  }
  0xd3   : > { %3357 = vmatprep.subr.bf16.mxu1 %v4656_v20  ;;  %v4745_v20 = vld [vmem:[#allocation10 + $0x460] ss:$16 sps:$4 sm:$0xff]  }
  0xd5   : > { %3167 = vmatpush1.bf16.msra.mxu0 %v4655_v21  ;;  %v4748_v21 = vld [vmem:[#allocation10 + $0x468] ss:$16 sps:$4 sm:$0xff]  }
  0xd6   : > { %3359 = vmatpush1.bf16.msra.mxu1 %v4658_v22  ;;  %3169 = vmatprep.subr.bf16.mxu0 %v4659_v23  ;;  %v4749_v22 = vld [vmem:[#allocation10 + $0x484] ss:$16 sps:$4 sm:$0xff]   ;;  %v4752_v23 = vld [vmem:[#allocation10 + $0x48c] ss:$16 sps:$4 sm:$0xff]  }
  0xd7   : > { %3361 = vmatprep.subr.bf16.mxu1 %v4662_v24  ;;  %v4751_v24 = vld [vmem:[#allocation10 + $0x480] ss:$16 sps:$4 sm:$0xff]  }
  0xd9   : > { %3171 = vmatpush1.bf16.msra.mxu0 %v4661_v25  ;;  %v4754_v25 = vld [vmem:[#allocation10 + $0x488] ss:$16 sps:$4 sm:$0xff]  }
  0xda   : > { %3363 = vmatpush1.bf16.msra.mxu1 %v4664_v26  ;;  %3173 = vmatprep.subr.bf16.mxu0 %v4665_v27  ;;  %v4755_v26 = vld [vmem:[#allocation10 + $0x4a4] ss:$16 sps:$4 sm:$0xff]   ;;  %v4758_v27 = vld [vmem:[#allocation10 + $0x4ac] ss:$16 sps:$4 sm:$0xff]  }
  0xdb   : > { %3365 = vmatprep.subr.bf16.mxu1 %v4668_v28  ;;  %v4757_v28 = vld [vmem:[#allocation10 + $0x4a0] ss:$16 sps:$4 sm:$0xff]  }
  0xdd   : > { %3175 = vmatpush1.bf16.msra.mxu0 %v4667_v30  ;;  %v4761_v30 = vld [vmem:[#allocation10 + $0x4c4] ss:$16 sps:$4 sm:$0xff]  }
  0xde   : > { %3367 = vmatpush1.bf16.msra.mxu1 %v4670_v31  ;;  %3177 = vmatprep.subr.bf16.mxu0 %v4671_v32  ;;  %v4764_v31 = vld [vmem:[#allocation10 + $0x4cc] ss:$16 sps:$4 sm:$0xff]   ;;  %v4763_v32 = vld [vmem:[#allocation10 + $0x4c0] ss:$16 sps:$4 sm:$0xff]  }
  0xdf   : > { %3369 = vmatprep.subr.bf16.mxu1 %v4674_v33  ;;  %v4766_v33 = vld [vmem:[#allocation10 + $0x4c8] ss:$16 sps:$4 sm:$0xff]  }
  0xe1   : > { %3179 = vmatpush1.bf16.msra.mxu0 %v4673_v34  ;;  %v4767_v34 = vld [vmem:[#allocation10 + $0x4e4] ss:$16 sps:$4 sm:$0xff]  }
  0xe2   : > { %3371 = vmatpush1.bf16.msra.mxu1 %v4676_v35  ;;  %3181 = vmatprep.subr.bf16.mxu0 %v4677_v36  ;;  %v4770_v35 = vld [vmem:[#allocation10 + $0x4ec] ss:$16 sps:$4 sm:$0xff]   ;;  %v4769_v36 = vld [vmem:[#allocation10 + $0x4e0] ss:$16 sps:$4 sm:$0xff]  }
  0xe3   : > { %3373 = vmatprep.subr.bf16.mxu1 %v4680_v37  ;;  %v4772_v37 = vld [vmem:[#allocation10 + $0x4e8] ss:$16 sps:$4 sm:$0xff]  }
  0xe5   : > { %3183 = vmatpush1.bf16.msra.mxu0 %v4679_v38  ;;  %v4773_v38 = vld [vmem:[#allocation10 + $0x504] ss:$16 sps:$4 sm:$0xff]  }
  0xe6   : > { %3375 = vmatpush1.bf16.msra.mxu1 %v4682_v39  ;;  %3185 = vmatprep.subr.bf16.mxu0 %v4683_v40  ;;  %v4776_v39 = vld [vmem:[#allocation10 + $0x50c] ss:$16 sps:$4 sm:$0xff]   ;;  %v4775_v40 = vld [vmem:[#allocation10 + $0x500] ss:$16 sps:$4 sm:$0xff]  }
  0xe7   : > { %3377 = vmatprep.subr.bf16.mxu1 %v4686_v41  ;;  %v4778_v41 = vld [vmem:[#allocation10 + $0x508] ss:$16 sps:$4 sm:$0xff]  }
  0xe9   : > { %3187 = vmatpush1.bf16.msra.mxu0 %v4685_v42  ;;  %v4779_v42 = vld [vmem:[#allocation10 + $0x524] ss:$16 sps:$4 sm:$0xff]  }
  0xea   : > { %3379 = vmatpush1.bf16.msra.mxu1 %v4688_v43  ;;  %3189 = vmatprep.subr.bf16.mxu0 %v4689_v44  ;;  %v4782_v43 = vld [vmem:[#allocation10 + $0x52c] ss:$16 sps:$4 sm:$0xff]   ;;  %v4781_v44 = vld [vmem:[#allocation10 + $0x520] ss:$16 sps:$4 sm:$0xff]  }
  0xeb   : > { %3381 = vmatprep.subr.bf16.mxu1 %v4692_v45  ;;  %v4784_v45 = vld [vmem:[#allocation10 + $0x528] ss:$16 sps:$4 sm:$0xff]  }
  0xed   : > { %3191 = vmatpush1.bf16.msra.mxu0 %v4691_v46  ;;  %v4785_v46 = vld [vmem:[#allocation10 + $0x544] ss:$16 sps:$4 sm:$0xff]  }
  0xee   : > { %3383 = vmatpush1.bf16.msra.mxu1 %v4694_v47  ;;  %3193 = vmatprep.subr.bf16.mxu0 %v4695_v48  ;;  %v4788_v47 = vld [vmem:[#allocation10 + $0x54c] ss:$16 sps:$4 sm:$0xff]   ;;  %v4787_v48 = vld [vmem:[#allocation10 + $0x540] ss:$16 sps:$4 sm:$0xff]  }
  0xef   : > { %3385 = vmatprep.subr.bf16.mxu1 %v4698_v49  ;;  %v4790_v49 = vld [vmem:[#allocation10 + $0x548] ss:$16 sps:$4 sm:$0xff]  }
  0xf1   : > { %3195 = vmatpush1.bf16.msra.mxu0 %v4697_v50  ;;  %v4791_v50 = vld [vmem:[#allocation10 + $0x564] ss:$16 sps:$4 sm:$0xff]  }
  0xf2   : > { %3387 = vmatpush1.bf16.msra.mxu1 %v4700_v51  ;;  %3197 = vmatprep.subr.bf16.mxu0 %v4701_v52  ;;  %v4794_v51 = vld [vmem:[#allocation10 + $0x56c] ss:$16 sps:$4 sm:$0xff]   ;;  %v4793_v52 = vld [vmem:[#allocation10 + $0x560] ss:$16 sps:$4 sm:$0xff]  }
  0xf3   : > { %3389 = vmatprep.subr.bf16.mxu1 %v4704_v53  ;;  %v4796_v53 = vld [vmem:[#allocation10 + $0x568] ss:$16 sps:$4 sm:$0xff]  }
  0xf5   : > { %3199 = vmatpush1.bf16.msra.mxu0 %v4703_v54  ;;  %v4797_v54 = vld [vmem:[#allocation10 + $0x584] ss:$16 sps:$4 sm:$0xff]  }
  0xf6   : > { %3391 = vmatpush1.bf16.msra.mxu1 %v4706_v55  ;;  %3201 = vmatprep.subr.bf16.mxu0 %v4707_v56  ;;  %v4800_v55 = vld [vmem:[#allocation10 + $0x58c] ss:$16 sps:$4 sm:$0xff]   ;;  %v4799_v56 = vld [vmem:[#allocation10 + $0x580] ss:$16 sps:$4 sm:$0xff]  }
  0xf7   : > { %3393 = vmatprep.subr.bf16.mxu1 %v4710_v57  ;;  %v4802_v57 = vld [vmem:[#allocation10 + $0x588] ss:$16 sps:$4 sm:$0xff]  }
  0xf9   : > { %3203 = vmatpush1.bf16.msra.mxu0 %v4709_v58  ;;  %v4803_v58 = vld [vmem:[#allocation10 + $0x5a4] ss:$16 sps:$4 sm:$0xff]  }
  0xfa   : > { %3395 = vmatpush1.bf16.msra.mxu1 %v4712_v59  ;;  %3205 = vmatprep.subr.bf16.mxu0 %v4713_v60  ;;  %v4806_v59 = vld [vmem:[#allocation10 + $0x5ac] ss:$16 sps:$4 sm:$0xff]   ;;  %v4805_v60 = vld [vmem:[#allocation10 + $0x5a0] ss:$16 sps:$4 sm:$0xff]  }
  0xfb   : > { %3397 = vmatprep.subr.bf16.mxu1 %v4716_v61  ;;  %v4808_v61 = vld [vmem:[#allocation10 + $0x5a8] ss:$16 sps:$4 sm:$0xff]  }
  0xfd   : > { %3207 = vmatpush1.bf16.msra.mxu0 %v4715_v62  ;;  %v4809_v62 = vld [vmem:[#allocation10 + $0x5c4] ss:$16 sps:$4 sm:$0xff]  }
  0xfe   : > { %3399 = vmatpush1.bf16.msra.mxu1 %v4718_v63  ;;  %3209 = vmatprep.subr.bf16.mxu0 %v4719_v0  ;;  %v4812_v63 = vld [vmem:[#allocation10 + $0x5cc] ss:$16 sps:$4 sm:$0xff]   ;;  %v4811_v0 = vld [vmem:[#allocation10 + $0x5c0] ss:$16 sps:$4 sm:$0xff]  }
  0xff   : > { %3401 = vmatprep.subr.bf16.mxu1 %v4722_v1  ;;  %v4814_v1 = vld [vmem:[#allocation10 + $0x5c8] ss:$16 sps:$4 sm:$0xff]  }
 0x101   : > { %3211 = vmatpush1.bf16.msra.mxu0 %v4721_v2  ;;  %v4815_v2 = vld [vmem:[#allocation10 + $0x5e4] ss:$16 sps:$4 sm:$0xff]  }
 0x102   : > { %3403 = vmatpush1.bf16.msra.mxu1 %v4724_v3  ;;  %3213 = vmatprep.subr.bf16.mxu0 %v4725_v4  ;;  %v4818_v3 = vld [vmem:[#allocation10 + $0x5ec] ss:$16 sps:$4 sm:$0xff]   ;;  %v4817_v4 = vld [vmem:[#allocation10 + $0x5e0] ss:$16 sps:$4 sm:$0xff]  }
 0x103   : > { %3405 = vmatprep.subr.bf16.mxu1 %v4728_v5  ;;  %v4820_v5 = vld [vmem:[#allocation10 + $0x5e8] ss:$16 sps:$4 sm:$0xff]  }
 0x104   : > { %1098 = vmatmul.mubr.f32.vlgmr.msra.gmra.mrb[0].mxu0 %v360_v8 }
 0x105   : > { %1311 = vmatmul.mubr.f32.vlgmr.msra.gmra.mrb[0].mxu1 %v360_v8  ;;  %3215 = vmatpush1.bf16.msra.mxu0 %v4727_v6  ;;  %v362_v6 = vld [vmem:[%s5969_s3 + $0x20] sm:$0xff] }
 0x106   : > { %3407 = vmatpush1.bf16.msra.mxu1 %v4730_v7  ;;  %3217 = vmatprep.subr.bf16.mxu0 %v4731_v9  ;;  %v942_v7 = vlaneseq }
 0x107   : > { %3409 = vmatprep.subr.bf16.mxu1 %v4734_v10  ;;  %1168 = vmatprep.mubr.f32.mxu0 %v363_v11  ;;  %v940_v10 = vld [vmem:[#allocation11] sm:$0xf] }
 0x108   : > { %1381 = vmatprep.mubr.f32.mxu1 %v363_v11  ;;  %v943_v8 = vshrl.u32 %v942_v7, 7 }
 0x109   : > { %3219 = vmatpush1.bf16.msra.mxu0 %v4733_v12 }
 0x10a   : > { %3411 = vmatpush1.bf16.msra.mxu1 %v4736_v13  ;;  %3221 = vmatprep.subr.bf16.mxu0 %v4737_v14  ;;  %v944_v9 = vsub.s32 0, %v943_v8  ;;  %v952_v11 = vsub.s32 2, %v943_v8  ;;  %v948_v12 = vsub.s32 1, %v943_v8  ;;  %v956_v13 = vsub.s32 3, %v943_v8 }
 0x10b   : > { %3413 = vmatprep.subr.bf16.mxu1 %v4740_v15 }
 0x10c   : > { %v945_v14 = vrot.slane %v940_v10, %v944_v9  ;;  %v953_v15 = vrot.slane %v940_v10, %v952_v11 }
 0x10d   : > { %3223 = vmatpush1.bf16.msra.mxu0 %v4739_v16  ;;  %v949_v16 = vrot.slane %v940_v10, %v948_v12 }
 0x10e   : > { %3415 = vmatpush1.bf16.msra.mxu1 %v4742_v17  ;;  %3225 = vmatprep.subr.bf16.mxu0 %v4743_v18 }
 0x10f   : > { %3417 = vmatprep.subr.bf16.mxu1 %v4746_v19  ;;  %v957_v19 = vrot.slane %v940_v10, %v956_v13 }
 0x111   : > { %3227 = vmatpush1.bf16.msra.mxu0 %v4745_v20 }
 0x112   : > { %3419 = vmatpush1.bf16.msra.mxu1 %v4748_v21  ;;  %3229 = vmatprep.subr.bf16.mxu0 %v4749_v22 }
 0x113   : > { %3421 = vmatprep.subr.bf16.mxu1 %v4752_v23 }
 0x115   : > { %3231 = vmatpush1.bf16.msra.mxu0 %v4751_v24 }
 0x116   : > { %3423 = vmatpush1.bf16.msra.mxu1 %v4754_v25  ;;  %3233 = vmatprep.subr.bf16.mxu0 %v4755_v26 }
 0x117   : > { %3425 = vmatprep.subr.bf16.mxu1 %v4758_v27 }
 0x119   : > { %3235 = vmatpush1.bf16.msra.mxu0 %v4757_v28 }
 0x11a   : > { %3427 = vmatpush1.bf16.msra.mxu1 %v4760_v29  ;;  %3237 = vmatprep.subr.bf16.mxu0 %v4761_v30 }
 0x11b   : > { %3429 = vmatprep.subr.bf16.mxu1 %v4764_v31 }
 0x11d   : > { %3239 = vmatpush1.bf16.msra.mxu0 %v4763_v32 }
 0x11e   : > { %3431 = vmatpush1.bf16.msra.mxu1 %v4766_v33  ;;  %3241 = vmatprep.subr.bf16.mxu0 %v4767_v34 }
 0x11f   : > { %3433 = vmatprep.subr.bf16.mxu1 %v4770_v35 }
 0x121   : > { %3243 = vmatpush1.bf16.msra.mxu0 %v4769_v36 }
 0x122   : > { %3435 = vmatpush1.bf16.msra.mxu1 %v4772_v37  ;;  %3245 = vmatprep.subr.bf16.mxu0 %v4773_v38 }
 0x123   : > { %3437 = vmatprep.subr.bf16.mxu1 %v4776_v39 }
 0x125   : > { %3247 = vmatpush1.bf16.msra.mxu0 %v4775_v40 }
 0x126   : > { %3439 = vmatpush1.bf16.msra.mxu1 %v4778_v41  ;;  %3249 = vmatprep.subr.bf16.mxu0 %v4779_v42 }
 0x127   : > { %3441 = vmatprep.subr.bf16.mxu1 %v4782_v43 }
 0x129   : > { %3251 = vmatpush1.bf16.msra.mxu0 %v4781_v44 }
 0x12a   : > { %3443 = vmatpush1.bf16.msra.mxu1 %v4784_v45  ;;  %3253 = vmatprep.subr.bf16.mxu0 %v4785_v46 }
 0x12b   : > { %3445 = vmatprep.subr.bf16.mxu1 %v4788_v47 }
 0x12d   : > { %3255 = vmatpush1.bf16.msra.mxu0 %v4787_v48 }
 0x12e   : > { %3447 = vmatpush1.bf16.msra.mxu1 %v4790_v49  ;;  %3257 = vmatprep.subr.bf16.mxu0 %v4791_v50 }
 0x12f   : > { %3449 = vmatprep.subr.bf16.mxu1 %v4794_v51 }
 0x131   : > { %3259 = vmatpush1.bf16.msra.mxu0 %v4793_v52 }
 0x132   : > { %3451 = vmatpush1.bf16.msra.mxu1 %v4796_v53  ;;  %3261 = vmatprep.subr.bf16.mxu0 %v4797_v54 }
 0x133   : > { %3453 = vmatprep.subr.bf16.mxu1 %v4800_v55 }
 0x135   : > { %3263 = vmatpush1.bf16.msra.mxu0 %v4799_v56 }
 0x136   : > { %3455 = vmatpush1.bf16.msra.mxu1 %v4802_v57  ;;  %3265 = vmatprep.subr.bf16.mxu0 %v4803_v58 }
 0x137   : > { %3457 = vmatprep.subr.bf16.mxu1 %v4806_v59 }
 0x139   : > { %3267 = vmatpush1.bf16.msra.mxu0 %v4805_v60 }
 0x13a   : > { %3459 = vmatpush1.bf16.msra.mxu1 %v4808_v61  ;;  %3269 = vmatprep.subr.bf16.mxu0 %v4809_v62 }
 0x13b   : > { %3461 = vmatprep.subr.bf16.mxu1 %v4812_v63 }
 0x13d   : > { %3271 = vmatpush1.bf16.msra.mxu0 %v4811_v0 }
 0x13e   : > { %3463 = vmatpush1.bf16.msra.mxu1 %v4814_v1  ;;  %3273 = vmatprep.subr.bf16.mxu0 %v4815_v2 }
 0x13f   : > { %3465 = vmatprep.subr.bf16.mxu1 %v4818_v3 }
 0x141   : > { %3275 = vmatpush1.bf16.msra.mxu0 %v4817_v4 }
 0x142   : > { %3467 = vmatpush1.bf16.msra.mxu1 %v4820_v5 }
 0x144   : > { %1169 = vmatmul.mubr.f32.vlgmr.msra.gmra.mrb[0].mxu0 %v362_v6 }
 0x145   : > { %1382 = vmatmul.mubr.f32.vlgmr.msra.gmra.mrb[0].mxu1 %v362_v6 }
 0x217   : > { %v1170_v17 = vpop.f32.mrb[0].mxu0 }
 0x218   : > { %v1383_v18 = vpop.f32.mrb[0].mxu1  ;;  %v3980_v20 = vadd.f32 %v1170_v17, %v945_v14  ;;  %v1172_v21 = vpop.f32.mrb[1].mxu0 }
 0x219   : > { %v1385_v22 = vpop.f32.mrb[1].mxu1  ;;  %v3982_v23 = vadd.f32 %v1383_v18, %v953_v15  ;;  %v3981_v24 = vadd.f32 %v1172_v21, %v949_v16 }
 0x21a   : > { %v1388_v25 = vmul.f32 %v3980_v20, %v3980_v20  ;;  %v3983_v27 = vadd.f32 %v1385_v22, %v957_v19 }
 0x21b   : > { %v1389_v26 = vmul.f32 %v3981_v24, %v3981_v24  ;;  %v1390_v28 = vmul.f32 %v3982_v23, %v3982_v23 }
 0x21c   : > { %v1391_v30 = vmul.f32 %v3983_v27, %v3983_v27 }
 0x21d   : > { %v1392_v29 = vadd.f32 %v1389_v26, %v1388_v25 }
 0x21f   : > { %v1393_v31 = vadd.f32 %v1392_v29, %v1390_v28 }
 0x221   : > { %v1394_v32 = vadd.f32 %v1393_v31, %v1391_v30 }
 0x223   : > { %1395 = vadd.xlane.f32.xlu0 %v1394_v32 }
 0x2b0   : > { %v1396_v33 = vpop.xlane.xlu0 %1395 }
 0x2b1   : > { %v1397_v34 = vmax.f32 %v1396_v33, 1e-24 }
 0x2b3   : > { %4821 = vrsqrt.f32 %v1397_v34 }
 0x2bd   : > { %v4822_v35 = vpop.eup %4821 }
 0x2be   : > { %v1399_v36 = vmul.f32 %v4822_v35, %v3980_v20  ;;  %v1400_v37 = vmul.f32 %v4822_v35, %v3981_v24  ;;  %v1401_v38 = vmul.f32 %v4822_v35, %v3982_v23  ;;  %v1402_v39 = vmul.f32 %v4822_v35, %v3983_v27 }
 0x2c0   : > { %1403 = vst [vmem:[#allocation3] sm:$0xff] %v1399_v36  ;;  %1404 = vst [vmem:[#allocation3 + $0x8] sm:$0xff] %v1400_v37 }
 0x2c1   : > { %1405 = vst [vmem:[#allocation3 + $0x10] sm:$0xff] %v1401_v38  ;;  %1406 = vst [vmem:[#allocation3 + $0x18] sm:$0xff] %v1402_v39 }
 0x2c2 PF: > { %v4823_v40 = vld [vmem:[%s5625_s19 + $0x4] ss:$16 sps:$4 sm:$0xff]   ;;  %v4825_v41 = vld [vmem:[%s5625_s19 + $0xc] ss:$16 sps:$4 sm:$0xff]   ;;  %v4827_v42 = vld [vmem:[%s5625_s19] ss:$16 sps:$4 sm:$0xff]  }
 0x2c3   : > { %3469 = vmatprep.subr.bf16.mxu0 %v4823_v40  ;;  %v4828_v43 = vld [vmem:[%s5625_s19 + $0x8] ss:$16 sps:$4 sm:$0xff]   ;;  %3725 = vmatprep.subr.bf16.mxu1 %v4825_v41  ;;  %v4829_v44 = vld [vmem:[%s5625_s19 + $0x24] ss:$16 sps:$4 sm:$0xff]   ;;  %v4831_v45 = vld [vmem:[%s5625_s19 + $0x2c] ss:$16 sps:$4 sm:$0xff]  }
 0x2c4   : > { %3471 = vmatpush1.bf16.msra.mxu0 %v4827_v42  ;;  %3727 = vmatpush1.bf16.msra.mxu1 %v4828_v43  ;;  %v4833_v46 = vld [vmem:[%s5625_s19 + $0x20] ss:$16 sps:$4 sm:$0xff]   ;;  %v4834_v47 = vld [vmem:[%s5625_s19 + $0x28] ss:$16 sps:$4 sm:$0xff]   ;;  %v4835_v48 = vld [vmem:[%s5625_s19 + $0x44] ss:$16 sps:$4 sm:$0xff]  }
 0x2c5   : > { %3473 = vmatprep.subr.bf16.mxu0 %v4829_v44  ;;  %3729 = vmatprep.subr.bf16.mxu1 %v4831_v45  ;;  %v4837_v49 = vld [vmem:[%s5625_s19 + $0x4c] ss:$16 sps:$4 sm:$0xff]   ;;  %v4839_v50 = vld [vmem:[%s5625_s19 + $0x40] ss:$16 sps:$4 sm:$0xff]   ;;  %v4840_v51 = vld [vmem:[%s5625_s19 + $0x48] ss:$16 sps:$4 sm:$0xff]  }
 0x2c6   : > { %v4841_v52 = vld [vmem:[%s5625_s19 + $0x64] ss:$16 sps:$4 sm:$0xff]   ;;  %v4843_v53 = vld [vmem:[%s5625_s19 + $0x6c] ss:$16 sps:$4 sm:$0xff]   ;;  %v4845_v54 = vld [vmem:[%s5625_s19 + $0x60] ss:$16 sps:$4 sm:$0xff]  }
 0x2c7   : > { %v4846_v55 = vld [vmem:[%s5625_s19 + $0x68] ss:$16 sps:$4 sm:$0xff]   ;;  %v4847_v56 = vld [vmem:[%s5625_s19 + $0x84] ss:$16 sps:$4 sm:$0xff]   ;;  %v4849_v57 = vld [vmem:[%s5625_s19 + $0x8c] ss:$16 sps:$4 sm:$0xff]  }
 0x2c8   : > { %3475 = vmatpush1.bf16.msra.mxu0 %v4833_v46  ;;  %3731 = vmatpush1.bf16.msra.mxu1 %v4834_v47  ;;  %v4851_v58 = vld [vmem:[%s5625_s19 + $0x80] ss:$16 sps:$4 sm:$0xff]   ;;  %v4852_v59 = vld [vmem:[%s5625_s19 + $0x88] ss:$16 sps:$4 sm:$0xff]   ;;  %v4853_v60 = vld [vmem:[%s5625_s19 + $0xa4] ss:$16 sps:$4 sm:$0xff]  }
 0x2c9   : > { %3477 = vmatprep.subr.bf16.mxu0 %v4835_v48  ;;  %3733 = vmatprep.subr.bf16.mxu1 %v4837_v49  ;;  %v4855_v61 = vld [vmem:[%s5625_s19 + $0xac] ss:$16 sps:$4 sm:$0xff]   ;;  %v4857_v62 = vld [vmem:[%s5625_s19 + $0xa0] ss:$16 sps:$4 sm:$0xff]   ;;  %v4858_v63 = vld [vmem:[%s5625_s19 + $0xa8] ss:$16 sps:$4 sm:$0xff]  }
 0x2ca   : > { %v4859_v0 = vld [vmem:[%s5625_s19 + $0xc4] ss:$16 sps:$4 sm:$0xff]   ;;  %v4861_v1 = vld [vmem:[%s5625_s19 + $0xcc] ss:$16 sps:$4 sm:$0xff]   ;;  %v4863_v2 = vld [vmem:[%s5625_s19 + $0xc0] ss:$16 sps:$4 sm:$0xff]  }
 0x2cb   : > { %v4864_v3 = vld [vmem:[%s5625_s19 + $0xc8] ss:$16 sps:$4 sm:$0xff]   ;;  %v4865_v4 = vld [vmem:[%s5625_s19 + $0xe4] ss:$16 sps:$4 sm:$0xff]   ;;  %v4867_v5 = vld [vmem:[%s5625_s19 + $0xec] ss:$16 sps:$4 sm:$0xff]  }
 0x2cc   : > { %3479 = vmatpush1.bf16.msra.mxu0 %v4839_v50  ;;  %3735 = vmatpush1.bf16.msra.mxu1 %v4840_v51  ;;  %v4869_v6 = vld [vmem:[%s5625_s19 + $0xe0] ss:$16 sps:$4 sm:$0xff]   ;;  %v4870_v7 = vld [vmem:[%s5625_s19 + $0xe8] ss:$16 sps:$4 sm:$0xff]   ;;  %v4871_v8 = vld [vmem:[%s5625_s19 + $0x104] ss:$16 sps:$4 sm:$0xff]  }
 0x2cd   : > { %3481 = vmatprep.subr.bf16.mxu0 %v4841_v52  ;;  %3737 = vmatprep.subr.bf16.mxu1 %v4843_v53  ;;  %v4873_v9 = vld [vmem:[%s5625_s19 + $0x10c] ss:$16 sps:$4 sm:$0xff]   ;;  %v4875_v10 = vld [vmem:[%s5625_s19 + $0x100] ss:$16 sps:$4 sm:$0xff]   ;;  %v4876_v11 = vld [vmem:[%s5625_s19 + $0x108] ss:$16 sps:$4 sm:$0xff]  }
 0x2ce   : > { %v4877_v12 = vld [vmem:[%s5625_s19 + $0x124] ss:$16 sps:$4 sm:$0xff]   ;;  %v4879_v13 = vld [vmem:[%s5625_s19 + $0x12c] ss:$16 sps:$4 sm:$0xff]   ;;  %v4881_v14 = vld [vmem:[%s5625_s19 + $0x120] ss:$16 sps:$4 sm:$0xff]  }
 0x2cf   : > { %v4882_v15 = vld [vmem:[%s5625_s19 + $0x128] ss:$16 sps:$4 sm:$0xff]   ;;  %v4883_v16 = vld [vmem:[%s5625_s19 + $0x144] ss:$16 sps:$4 sm:$0xff]   ;;  %v4885_v17 = vld [vmem:[%s5625_s19 + $0x14c] ss:$16 sps:$4 sm:$0xff]  }
 0x2d0   : > { %3483 = vmatpush1.bf16.msra.mxu0 %v4845_v54  ;;  %3739 = vmatpush1.bf16.msra.mxu1 %v4846_v55  ;;  %v4887_v18 = vld [vmem:[%s5625_s19 + $0x140] ss:$16 sps:$4 sm:$0xff]   ;;  %v4888_v19 = vld [vmem:[%s5625_s19 + $0x148] ss:$16 sps:$4 sm:$0xff]   ;;  %v4889_v20 = vld [vmem:[%s5625_s19 + $0x164] ss:$16 sps:$4 sm:$0xff]  }
 0x2d1   : > { %3485 = vmatprep.subr.bf16.mxu0 %v4847_v56  ;;  %3741 = vmatprep.subr.bf16.mxu1 %v4849_v57  ;;  %v4891_v21 = vld [vmem:[%s5625_s19 + $0x16c] ss:$16 sps:$4 sm:$0xff]   ;;  %v4893_v23 = vld [vmem:[%s5625_s19 + $0x160] ss:$16 sps:$4 sm:$0xff]   ;;  %v4894_v24 = vld [vmem:[%s5625_s19 + $0x168] ss:$16 sps:$4 sm:$0xff]  }
 0x2d2   : > { %v1412_v22 = vld [vmem:[%s5643_s14 + $0x8] sm:$0xff]  ;;  %v4895_v25 = vld [vmem:[%s5625_s19 + $0x184] ss:$16 sps:$4 sm:$0xff]   ;;  %v4899_v27 = vld [vmem:[%s5625_s19 + $0x180] ss:$16 sps:$4 sm:$0xff]   ;;  %p3077_p1 = scmp.ne.s32.totalorder %s5467_s6, 2 }
 0x2d3   : > { %2251 = vmatprep.mubr.f32.mxu0 %v1412_v22  ;;  %2535 = vmatprep.mubr.f32.mxu1 %v1412_v22  ;;  %v4897_v26 = vld [vmem:[%s5625_s19 + $0x18c] ss:$16 sps:$4 sm:$0xff]   ;;  %v4900_v28 = vld [vmem:[%s5625_s19 + $0x188] ss:$16 sps:$4 sm:$0xff]   ;;  %v4901_v29 = vld [vmem:[%s5625_s19 + $0x1a4] ss:$16 sps:$4 sm:$0xff]  }
 0x2d4   : > { %3487 = vmatpush1.bf16.msra.mxu0 %v4851_v58  ;;  %3743 = vmatpush1.bf16.msra.mxu1 %v4852_v59  ;;  %v4903_v30 = vld [vmem:[%s5625_s19 + $0x1ac] ss:$16 sps:$4 sm:$0xff]   ;;  %v4905_v31 = vld [vmem:[%s5625_s19 + $0x1a0] ss:$16 sps:$4 sm:$0xff]   ;;  %v4906_v32 = vld [vmem:[%s5625_s19 + $0x1a8] ss:$16 sps:$4 sm:$0xff]  }
 0x2d5   : > { %3489 = vmatprep.subr.bf16.mxu0 %v4853_v60  ;;  %3745 = vmatprep.subr.bf16.mxu1 %v4855_v61  ;;  %v4907_v33 = vld [vmem:[%s5625_s19 + $0x1c4] ss:$16 sps:$4 sm:$0xff]   ;;  %v4909_v34 = vld [vmem:[%s5625_s19 + $0x1cc] ss:$16 sps:$4 sm:$0xff]   ;;  %v4911_v35 = vld [vmem:[%s5625_s19 + $0x1c0] ss:$16 sps:$4 sm:$0xff]  }
 0x2d6   : > { %v4912_v36 = vld [vmem:[%s5625_s19 + $0x1c8] ss:$16 sps:$4 sm:$0xff]   ;;  %v4913_v37 = vld [vmem:[%s5625_s19 + $0x1e4] ss:$16 sps:$4 sm:$0xff]   ;;  %v4915_v38 = vld [vmem:[%s5625_s19 + $0x1ec] ss:$16 sps:$4 sm:$0xff]  }
 0x2d7   : > { %v4917_v39 = vld [vmem:[%s5625_s19 + $0x1e0] ss:$16 sps:$4 sm:$0xff]   ;;  %v4918_v40 = vld [vmem:[%s5625_s19 + $0x1e8] ss:$16 sps:$4 sm:$0xff]   ;;  %v4919_v41 = vld [vmem:[%s5625_s19 + $0x204] ss:$16 sps:$4 sm:$0xff]  }
 0x2d8   : > { %3491 = vmatpush1.bf16.msra.mxu0 %v4857_v62  ;;  %3747 = vmatpush1.bf16.msra.mxu1 %v4858_v63  ;;  %v4922_v42 = vld [vmem:[%s5625_s19 + $0x20c] ss:$16 sps:$4 sm:$0xff]   ;;  %v4921_v43 = vld [vmem:[%s5625_s19 + $0x200] ss:$16 sps:$4 sm:$0xff]   ;;  %v4924_v44 = vld [vmem:[%s5625_s19 + $0x208] ss:$16 sps:$4 sm:$0xff]  }
 0x2d9   : > { %3493 = vmatprep.subr.bf16.mxu0 %v4859_v0  ;;  %3749 = vmatprep.subr.bf16.mxu1 %v4861_v1  ;;  %v1411_v45 = vld [vmem:[%s5643_s14] sm:$0xff]  ;;  %v4928_v47 = vld [vmem:[%s5625_s19 + $0x22c] ss:$16 sps:$4 sm:$0xff]   ;;  %v4930_v49 = vld [vmem:[%s5625_s19 + $0x228] ss:$16 sps:$4 sm:$0xff]   ;;  %s2956_s12 = sld [smem:[#allocation4]] (!%p3077_p1) }
 0x2da   : > { %v4925_v46 = vld [vmem:[%s5625_s19 + $0x224] ss:$16 sps:$4 sm:$0xff]   ;;  %v4927_v48 = vld [vmem:[%s5625_s19 + $0x220] ss:$16 sps:$4 sm:$0xff]   ;;  %v4934_v51 = vld [vmem:[%s5625_s19 + $0x24c] ss:$16 sps:$4 sm:$0xff]  }
 0x2db   : > { %v4931_v50 = vld [vmem:[%s5625_s19 + $0x244] ss:$16 sps:$4 sm:$0xff]   ;;  %v4933_v52 = vld [vmem:[%s5625_s19 + $0x240] ss:$16 sps:$4 sm:$0xff]   ;;  %v4936_v53 = vld [vmem:[%s5625_s19 + $0x248] ss:$16 sps:$4 sm:$0xff]  }
 0x2dc   : > { %3495 = vmatpush1.bf16.msra.mxu0 %v4863_v2  ;;  %3751 = vmatpush1.bf16.msra.mxu1 %v4864_v3  ;;  %v4937_v54 = vld [vmem:[%s5625_s19 + $0x264] ss:$16 sps:$4 sm:$0xff]   ;;  %v4940_v55 = vld [vmem:[%s5625_s19 + $0x26c] ss:$16 sps:$4 sm:$0xff]   ;;  %v4939_v56 = vld [vmem:[%s5625_s19 + $0x260] ss:$16 sps:$4 sm:$0xff]  }
 0x2dd   : > { %3497 = vmatprep.subr.bf16.mxu0 %v4865_v4  ;;  %3753 = vmatprep.subr.bf16.mxu1 %v4867_v5  ;;  %v4942_v57 = vld [vmem:[%s5625_s19 + $0x268] ss:$16 sps:$4 sm:$0xff]   ;;  %v4943_v58 = vld [vmem:[%s5625_s19 + $0x284] ss:$16 sps:$4 sm:$0xff]   ;;  %v4946_v59 = vld [vmem:[%s5625_s19 + $0x28c] ss:$16 sps:$4 sm:$0xff]  }
 0x2de   : > { %v4945_v60 = vld [vmem:[%s5625_s19 + $0x280] ss:$16 sps:$4 sm:$0xff]   ;;  %v4948_v61 = vld [vmem:[%s5625_s19 + $0x288] ss:$16 sps:$4 sm:$0xff]   ;;  %v4949_v62 = vld [vmem:[%s5625_s19 + $0x2a4] ss:$16 sps:$4 sm:$0xff]  }
 0x2df   : > { %v4952_v63 = vld [vmem:[%s5625_s19 + $0x2ac] ss:$16 sps:$4 sm:$0xff]   ;;  %v4951_v0 = vld [vmem:[%s5625_s19 + $0x2a0] ss:$16 sps:$4 sm:$0xff]   ;;  %v4954_v1 = vld [vmem:[%s5625_s19 + $0x2a8] ss:$16 sps:$4 sm:$0xff]  }
 0x2e0   : > { %3499 = vmatpush1.bf16.msra.mxu0 %v4869_v6  ;;  %3755 = vmatpush1.bf16.msra.mxu1 %v4870_v7  ;;  %v4955_v2 = vld [vmem:[%s5625_s19 + $0x2c4] ss:$16 sps:$4 sm:$0xff]   ;;  %v4958_v3 = vld [vmem:[%s5625_s19 + $0x2cc] ss:$16 sps:$4 sm:$0xff]   ;;  %v4957_v5 = vld [vmem:[%s5625_s19 + $0x2c0] ss:$16 sps:$4 sm:$0xff]  }
 0x2e1   : > { %3501 = vmatprep.subr.bf16.mxu0 %v4871_v8  ;;  %3757 = vmatprep.subr.bf16.mxu1 %v4873_v9  ;;  %v1414_v4 = vld [vmem:[%s5643_s14 + $0x18] sm:$0xff]  ;;  %v4961_v7 = vld [vmem:[%s5625_s19 + $0x2e4] ss:$16 sps:$4 sm:$0xff]   ;;  %v4963_v9 = vld [vmem:[%s5625_s19 + $0x2e0] ss:$16 sps:$4 sm:$0xff]   ;;  %vm2959_vm0 = vcmask (!%p3077_p1), 64512  }
 0x2e2   : > { %v4960_v6 = vld [vmem:[%s5625_s19 + $0x2c8] ss:$16 sps:$4 sm:$0xff]   ;;  %v4964_v8 = vld [vmem:[%s5625_s19 + $0x2ec] ss:$16 sps:$4 sm:$0xff]  }
 0x2e3   : > { %v4984_v22 = vld [vmem:[%s5625_s19 + $0x348] ss:$16 sps:$4 sm:$0xff]  }
 0x2e4   : > { %3503 = vmatpush1.bf16.msra.mxu0 %v4875_v10  ;;  %3759 = vmatpush1.bf16.msra.mxu1 %v4876_v11  ;;  %v4966_v10 = vld [vmem:[%s5625_s19 + $0x2e8] ss:$16 sps:$4 sm:$0xff]   ;;  %v4967_v11 = vld [vmem:[%s5625_s19 + $0x304] ss:$16 sps:$4 sm:$0xff]  }
 0x2e5   : > { %3505 = vmatprep.subr.bf16.mxu0 %v4877_v12  ;;  %3761 = vmatprep.subr.bf16.mxu1 %v4879_v13  ;;  %v4970_v12 = vld [vmem:[%s5625_s19 + $0x30c] ss:$16 sps:$4 sm:$0xff]   ;;  %v4969_v13 = vld [vmem:[%s5625_s19 + $0x300] ss:$16 sps:$4 sm:$0xff]  }
 0x2e8   : > { %3507 = vmatpush1.bf16.msra.mxu0 %v4881_v14  ;;  %3763 = vmatpush1.bf16.msra.mxu1 %v4882_v15  ;;  %v4972_v14 = vld [vmem:[%s5625_s19 + $0x308] ss:$16 sps:$4 sm:$0xff]   ;;  %v4973_v15 = vld [vmem:[%s5625_s19 + $0x324] ss:$16 sps:$4 sm:$0xff]  }
 0x2e9   : > { %3509 = vmatprep.subr.bf16.mxu0 %v4883_v16  ;;  %3765 = vmatprep.subr.bf16.mxu1 %v4885_v17  ;;  %v4976_v16 = vld [vmem:[%s5625_s19 + $0x32c] ss:$16 sps:$4 sm:$0xff]   ;;  %v4975_v17 = vld [vmem:[%s5625_s19 + $0x320] ss:$16 sps:$4 sm:$0xff]  }
 0x2ec   : > { %3511 = vmatpush1.bf16.msra.mxu0 %v4887_v18  ;;  %3767 = vmatpush1.bf16.msra.mxu1 %v4888_v19  ;;  %v4978_v18 = vld [vmem:[%s5625_s19 + $0x328] ss:$16 sps:$4 sm:$0xff]   ;;  %v4979_v19 = vld [vmem:[%s5625_s19 + $0x344] ss:$16 sps:$4 sm:$0xff]  }
 0x2ed   : > { %3513 = vmatprep.subr.bf16.mxu0 %v4889_v20  ;;  %3769 = vmatprep.subr.bf16.mxu1 %v4891_v21  ;;  %v4982_v20 = vld [vmem:[%s5625_s19 + $0x34c] ss:$16 sps:$4 sm:$0xff]   ;;  %v4981_v21 = vld [vmem:[%s5625_s19 + $0x340] ss:$16 sps:$4 sm:$0xff]  }
 0x2f0   : > { %3515 = vmatpush1.bf16.msra.mxu0 %v4893_v23  ;;  %3771 = vmatpush1.bf16.msra.mxu1 %v4894_v24  ;;  %v4985_v23 = vld [vmem:[%s5625_s19 + $0x364] ss:$16 sps:$4 sm:$0xff]   ;;  %v4988_v24 = vld [vmem:[%s5625_s19 + $0x36c] ss:$16 sps:$4 sm:$0xff]  }
 0x2f1   : > { %3517 = vmatprep.subr.bf16.mxu0 %v4895_v25  ;;  %3773 = vmatprep.subr.bf16.mxu1 %v4897_v26  ;;  %v4987_v25 = vld [vmem:[%s5625_s19 + $0x360] ss:$16 sps:$4 sm:$0xff]   ;;  %v4990_v26 = vld [vmem:[%s5625_s19 + $0x368] ss:$16 sps:$4 sm:$0xff]  }
 0x2f4   : > { %3519 = vmatpush1.bf16.msra.mxu0 %v4899_v27  ;;  %3775 = vmatpush1.bf16.msra.mxu1 %v4900_v28  ;;  %v4991_v27 = vld [vmem:[%s5625_s19 + $0x384] ss:$16 sps:$4 sm:$0xff]   ;;  %v4994_v28 = vld [vmem:[%s5625_s19 + $0x38c] ss:$16 sps:$4 sm:$0xff]  }
 0x2f5   : > { %3521 = vmatprep.subr.bf16.mxu0 %v4901_v29  ;;  %3777 = vmatprep.subr.bf16.mxu1 %v4903_v30  ;;  %v4993_v29 = vld [vmem:[%s5625_s19 + $0x380] ss:$16 sps:$4 sm:$0xff]   ;;  %v4996_v30 = vld [vmem:[%s5625_s19 + $0x388] ss:$16 sps:$4 sm:$0xff]  }
 0x2f8   : > { %3523 = vmatpush1.bf16.msra.mxu0 %v4905_v31  ;;  %3779 = vmatpush1.bf16.msra.mxu1 %v4906_v32  ;;  %v4997_v31 = vld [vmem:[%s5625_s19 + $0x3a4] ss:$16 sps:$4 sm:$0xff]   ;;  %v5000_v32 = vld [vmem:[%s5625_s19 + $0x3ac] ss:$16 sps:$4 sm:$0xff]  }
 0x2f9   : > { %3525 = vmatprep.subr.bf16.mxu0 %v4907_v33  ;;  %3781 = vmatprep.subr.bf16.mxu1 %v4909_v34  ;;  %v4999_v33 = vld [vmem:[%s5625_s19 + $0x3a0] ss:$16 sps:$4 sm:$0xff]   ;;  %v5002_v34 = vld [vmem:[%s5625_s19 + $0x3a8] ss:$16 sps:$4 sm:$0xff]  }
 0x2fc   : > { %3527 = vmatpush1.bf16.msra.mxu0 %v4911_v35  ;;  %3783 = vmatpush1.bf16.msra.mxu1 %v4912_v36  ;;  %v5003_v35 = vld [vmem:[%s5625_s19 + $0x3c4] ss:$16 sps:$4 sm:$0xff]   ;;  %v5006_v36 = vld [vmem:[%s5625_s19 + $0x3cc] ss:$16 sps:$4 sm:$0xff]  }
 0x2fd   : > { %3529 = vmatprep.subr.bf16.mxu0 %v4913_v37  ;;  %3785 = vmatprep.subr.bf16.mxu1 %v4915_v38  ;;  %v5005_v37 = vld [vmem:[%s5625_s19 + $0x3c0] ss:$16 sps:$4 sm:$0xff]   ;;  %v5008_v38 = vld [vmem:[%s5625_s19 + $0x3c8] ss:$16 sps:$4 sm:$0xff]  }
 0x300   : > { %3531 = vmatpush1.bf16.msra.mxu0 %v4917_v39  ;;  %3787 = vmatpush1.bf16.msra.mxu1 %v4918_v40  ;;  %v5009_v39 = vld [vmem:[%s5625_s19 + $0x3e4] ss:$16 sps:$4 sm:$0xff]   ;;  %v5012_v40 = vld [vmem:[%s5625_s19 + $0x3ec] ss:$16 sps:$4 sm:$0xff]  }
 0x301   : > { %3533 = vmatprep.subr.bf16.mxu0 %v4919_v41  ;;  %3789 = vmatprep.subr.bf16.mxu1 %v4922_v42  ;;  %v5011_v41 = vld [vmem:[%s5625_s19 + $0x3e0] ss:$16 sps:$4 sm:$0xff]   ;;  %v5014_v42 = vld [vmem:[%s5625_s19 + $0x3e8] ss:$16 sps:$4 sm:$0xff]  }
 0x303   : > { %2252 = vmatmul.mubr.f32.vlgmr.msra.gmra.mrb[0].mxu0 %v1411_v45  ;;  %2536 = vmatmul.mubr.f32.vlgmr.msra.gmra.mrb[0].mxu1 %v1411_v45  ;;  %v5017_v45 = vld [vmem:[%s5625_s19 + $0x400] ss:$16 sps:$4 sm:$0xff]  }
 0x304   : > { %3535 = vmatpush1.bf16.msra.mxu0 %v4921_v43  ;;  %3791 = vmatpush1.bf16.msra.mxu1 %v4924_v44  ;;  %v5015_v43 = vld [vmem:[%s5625_s19 + $0x404] ss:$16 sps:$4 sm:$0xff]   ;;  %v5018_v44 = vld [vmem:[%s5625_s19 + $0x40c] ss:$16 sps:$4 sm:$0xff]  }
 0x305   : > { %3537 = vmatprep.subr.bf16.mxu0 %v4925_v46  ;;  %3793 = vmatprep.subr.bf16.mxu1 %v4928_v47  ;;  %v5020_v46 = vld [vmem:[%s5625_s19 + $0x408] ss:$16 sps:$4 sm:$0xff]   ;;  %v1413_v47 = vld [vmem:[%s5643_s14 + $0x10] sm:$0xff] }
 0x306   : > { %2322 = vmatprep.mubr.f32.mxu0 %v1414_v4  ;;  %2606 = vmatprep.mubr.f32.mxu1 %v1414_v4  ;;  %v5050_v4 = vld [vmem:[%s5625_s19 + $0x4a8] ss:$16 sps:$4 sm:$0xff]  }
 0x308   : > { %3539 = vmatpush1.bf16.msra.mxu0 %v4927_v48  ;;  %3795 = vmatpush1.bf16.msra.mxu1 %v4930_v49  ;;  %v5021_v48 = vld [vmem:[%s5625_s19 + $0x424] ss:$16 sps:$4 sm:$0xff]   ;;  %v5024_v49 = vld [vmem:[%s5625_s19 + $0x42c] ss:$16 sps:$4 sm:$0xff]  }
 0x309   : > { %3541 = vmatprep.subr.bf16.mxu0 %v4931_v50  ;;  %3797 = vmatprep.subr.bf16.mxu1 %v4934_v51  ;;  %v1416_v50 = vld [vmem:[%s5643_s14 + $0x28] sm:$0xff]  ;;  %v5023_v51 = vld [vmem:[%s5625_s19 + $0x420] ss:$16 sps:$4 sm:$0xff]  }
 0x30c   : > { %3543 = vmatpush1.bf16.msra.mxu0 %v4933_v52  ;;  %3799 = vmatpush1.bf16.msra.mxu1 %v4936_v53  ;;  %v5026_v52 = vld [vmem:[%s5625_s19 + $0x428] ss:$16 sps:$4 sm:$0xff]   ;;  %v5027_v53 = vld [vmem:[%s5625_s19 + $0x444] ss:$16 sps:$4 sm:$0xff]  }
 0x30d   : > { %3545 = vmatprep.subr.bf16.mxu0 %v4937_v54  ;;  %3801 = vmatprep.subr.bf16.mxu1 %v4940_v55  ;;  %v5030_v54 = vld [vmem:[%s5625_s19 + $0x44c] ss:$16 sps:$4 sm:$0xff]   ;;  %v5029_v55 = vld [vmem:[%s5625_s19 + $0x440] ss:$16 sps:$4 sm:$0xff]  }
 0x310   : > { %3547 = vmatpush1.bf16.msra.mxu0 %v4939_v56  ;;  %3803 = vmatpush1.bf16.msra.mxu1 %v4942_v57  ;;  %v5032_v56 = vld [vmem:[%s5625_s19 + $0x448] ss:$16 sps:$4 sm:$0xff]   ;;  %v5033_v57 = vld [vmem:[%s5625_s19 + $0x464] ss:$16 sps:$4 sm:$0xff]  }
 0x311   : > { %3549 = vmatprep.subr.bf16.mxu0 %v4943_v58  ;;  %3805 = vmatprep.subr.bf16.mxu1 %v4946_v59  ;;  %v5036_v58 = vld [vmem:[%s5625_s19 + $0x46c] ss:$16 sps:$4 sm:$0xff]   ;;  %v5035_v59 = vld [vmem:[%s5625_s19 + $0x460] ss:$16 sps:$4 sm:$0xff]  }
 0x314   : > { %3551 = vmatpush1.bf16.msra.mxu0 %v4945_v60  ;;  %3807 = vmatpush1.bf16.msra.mxu1 %v4948_v61  ;;  %v5038_v60 = vld [vmem:[%s5625_s19 + $0x468] ss:$16 sps:$4 sm:$0xff]   ;;  %v5039_v61 = vld [vmem:[%s5625_s19 + $0x484] ss:$16 sps:$4 sm:$0xff]  }
 0x315   : > { %3553 = vmatprep.subr.bf16.mxu0 %v4949_v62  ;;  %3809 = vmatprep.subr.bf16.mxu1 %v4952_v63  ;;  %v5042_v62 = vld [vmem:[%s5625_s19 + $0x48c] ss:$16 sps:$4 sm:$0xff]   ;;  %v5041_v63 = vld [vmem:[%s5625_s19 + $0x480] ss:$16 sps:$4 sm:$0xff]  }
 0x318   : > { %3555 = vmatpush1.bf16.msra.mxu0 %v4951_v0  ;;  %3811 = vmatpush1.bf16.msra.mxu1 %v4954_v1  ;;  %v5044_v0 = vld [vmem:[%s5625_s19 + $0x488] ss:$16 sps:$4 sm:$0xff]   ;;  %v5045_v1 = vld [vmem:[%s5625_s19 + $0x4a4] ss:$16 sps:$4 sm:$0xff]  }
 0x319   : > { %3557 = vmatprep.subr.bf16.mxu0 %v4955_v2  ;;  %3813 = vmatprep.subr.bf16.mxu1 %v4958_v3  ;;  %v5048_v2 = vld [vmem:[%s5625_s19 + $0x4ac] ss:$16 sps:$4 sm:$0xff]   ;;  %v5047_v3 = vld [vmem:[%s5625_s19 + $0x4a0] ss:$16 sps:$4 sm:$0xff]  }
 0x31c   : > { %3559 = vmatpush1.bf16.msra.mxu0 %v4957_v5  ;;  %3815 = vmatpush1.bf16.msra.mxu1 %v4960_v6  ;;  %v5051_v5 = vld [vmem:[%s5625_s19 + $0x4c4] ss:$16 sps:$4 sm:$0xff]   ;;  %v5054_v6 = vld [vmem:[%s5625_s19 + $0x4cc] ss:$16 sps:$4 sm:$0xff]  }
 0x31d   : > { %3561 = vmatprep.subr.bf16.mxu0 %v4961_v7  ;;  %3817 = vmatprep.subr.bf16.mxu1 %v4964_v8  ;;  %v5053_v7 = vld [vmem:[%s5625_s19 + $0x4c0] ss:$16 sps:$4 sm:$0xff]   ;;  %v5056_v8 = vld [vmem:[%s5625_s19 + $0x4c8] ss:$16 sps:$4 sm:$0xff]  }
 0x320   : > { %3563 = vmatpush1.bf16.msra.mxu0 %v4963_v9  ;;  %3819 = vmatpush1.bf16.msra.mxu1 %v4966_v10  ;;  %v5057_v9 = vld [vmem:[%s5625_s19 + $0x4e4] ss:$16 sps:$4 sm:$0xff]   ;;  %v5060_v10 = vld [vmem:[%s5625_s19 + $0x4ec] ss:$16 sps:$4 sm:$0xff]  }
 0x321   : > { %3565 = vmatprep.subr.bf16.mxu0 %v4967_v11  ;;  %3821 = vmatprep.subr.bf16.mxu1 %v4970_v12  ;;  %v5059_v11 = vld [vmem:[%s5625_s19 + $0x4e0] ss:$16 sps:$4 sm:$0xff]   ;;  %v5062_v12 = vld [vmem:[%s5625_s19 + $0x4e8] ss:$16 sps:$4 sm:$0xff]  }
 0x324   : > { %3567 = vmatpush1.bf16.msra.mxu0 %v4969_v13  ;;  %3823 = vmatpush1.bf16.msra.mxu1 %v4972_v14  ;;  %v5063_v13 = vld [vmem:[%s5625_s19 + $0x504] ss:$16 sps:$4 sm:$0xff]   ;;  %v5066_v14 = vld [vmem:[%s5625_s19 + $0x50c] ss:$16 sps:$4 sm:$0xff]  }
 0x325   : > { %3569 = vmatprep.subr.bf16.mxu0 %v4973_v15  ;;  %3825 = vmatprep.subr.bf16.mxu1 %v4976_v16  ;;  %v5065_v15 = vld [vmem:[%s5625_s19 + $0x500] ss:$16 sps:$4 sm:$0xff]   ;;  %v5068_v16 = vld [vmem:[%s5625_s19 + $0x508] ss:$16 sps:$4 sm:$0xff]  }
 0x328   : > { %3571 = vmatpush1.bf16.msra.mxu0 %v4975_v17  ;;  %3827 = vmatpush1.bf16.msra.mxu1 %v4978_v18  ;;  %v5069_v17 = vld [vmem:[%s5625_s19 + $0x524] ss:$16 sps:$4 sm:$0xff]   ;;  %v5072_v18 = vld [vmem:[%s5625_s19 + $0x52c] ss:$16 sps:$4 sm:$0xff]  }
 0x329   : > { %3573 = vmatprep.subr.bf16.mxu0 %v4979_v19  ;;  %3829 = vmatprep.subr.bf16.mxu1 %v4982_v20  ;;  %v5071_v19 = vld [vmem:[%s5625_s19 + $0x520] ss:$16 sps:$4 sm:$0xff]   ;;  %v5074_v20 = vld [vmem:[%s5625_s19 + $0x528] ss:$16 sps:$4 sm:$0xff]  }
 0x32c   : > { %3575 = vmatpush1.bf16.msra.mxu0 %v4981_v21  ;;  %3831 = vmatpush1.bf16.msra.mxu1 %v4984_v22  ;;  %v5075_v21 = vld [vmem:[%s5625_s19 + $0x544] ss:$16 sps:$4 sm:$0xff]   ;;  %v5078_v22 = vld [vmem:[%s5625_s19 + $0x54c] ss:$16 sps:$4 sm:$0xff]  }
 0x32d   : > { %3577 = vmatprep.subr.bf16.mxu0 %v4985_v23  ;;  %3833 = vmatprep.subr.bf16.mxu1 %v4988_v24  ;;  %v5077_v23 = vld [vmem:[%s5625_s19 + $0x540] ss:$16 sps:$4 sm:$0xff]   ;;  %v5080_v24 = vld [vmem:[%s5625_s19 + $0x548] ss:$16 sps:$4 sm:$0xff]  }
 0x330   : > { %3579 = vmatpush1.bf16.msra.mxu0 %v4987_v25  ;;  %3835 = vmatpush1.bf16.msra.mxu1 %v4990_v26  ;;  %v5081_v25 = vld [vmem:[%s5625_s19 + $0x564] ss:$16 sps:$4 sm:$0xff]   ;;  %v5084_v26 = vld [vmem:[%s5625_s19 + $0x56c] ss:$16 sps:$4 sm:$0xff]  }
 0x331   : > { %3581 = vmatprep.subr.bf16.mxu0 %v4991_v27  ;;  %3837 = vmatprep.subr.bf16.mxu1 %v4994_v28  ;;  %v5083_v27 = vld [vmem:[%s5625_s19 + $0x560] ss:$16 sps:$4 sm:$0xff]   ;;  %v5086_v28 = vld [vmem:[%s5625_s19 + $0x568] ss:$16 sps:$4 sm:$0xff]  }
 0x334   : > { %3583 = vmatpush1.bf16.msra.mxu0 %v4993_v29  ;;  %3839 = vmatpush1.bf16.msra.mxu1 %v4996_v30  ;;  %v5087_v29 = vld [vmem:[%s5625_s19 + $0x584] ss:$16 sps:$4 sm:$0xff]   ;;  %v5090_v30 = vld [vmem:[%s5625_s19 + $0x58c] ss:$16 sps:$4 sm:$0xff]  }
 0x335   : > { %3585 = vmatprep.subr.bf16.mxu0 %v4997_v31  ;;  %3841 = vmatprep.subr.bf16.mxu1 %v5000_v32  ;;  %v5089_v31 = vld [vmem:[%s5625_s19 + $0x580] ss:$16 sps:$4 sm:$0xff]   ;;  %v5092_v32 = vld [vmem:[%s5625_s19 + $0x588] ss:$16 sps:$4 sm:$0xff]  }
 0x338   : > { %3587 = vmatpush1.bf16.msra.mxu0 %v4999_v33  ;;  %3843 = vmatpush1.bf16.msra.mxu1 %v5002_v34  ;;  %v5093_v33 = vld [vmem:[%s5625_s19 + $0x5a4] ss:$16 sps:$4 sm:$0xff]   ;;  %v5096_v34 = vld [vmem:[%s5625_s19 + $0x5ac] ss:$16 sps:$4 sm:$0xff]  }
 0x339   : > { %3589 = vmatprep.subr.bf16.mxu0 %v5003_v35  ;;  %3845 = vmatprep.subr.bf16.mxu1 %v5006_v36  ;;  %v5095_v35 = vld [vmem:[%s5625_s19 + $0x5a0] ss:$16 sps:$4 sm:$0xff]   ;;  %v5098_v36 = vld [vmem:[%s5625_s19 + $0x5a8] ss:$16 sps:$4 sm:$0xff]  }
 0x33c   : > { %3591 = vmatpush1.bf16.msra.mxu0 %v5005_v37  ;;  %3847 = vmatpush1.bf16.msra.mxu1 %v5008_v38  ;;  %v5099_v37 = vld [vmem:[%s5625_s19 + $0x5c4] ss:$16 sps:$4 sm:$0xff]   ;;  %v5102_v38 = vld [vmem:[%s5625_s19 + $0x5cc] ss:$16 sps:$4 sm:$0xff]  }
 0x33d   : > { %3593 = vmatprep.subr.bf16.mxu0 %v5009_v39  ;;  %3849 = vmatprep.subr.bf16.mxu1 %v5012_v40  ;;  %v5101_v39 = vld [vmem:[%s5625_s19 + $0x5c0] ss:$16 sps:$4 sm:$0xff]   ;;  %v5104_v40 = vld [vmem:[%s5625_s19 + $0x5c8] ss:$16 sps:$4 sm:$0xff]  }
 0x340   : > { %3595 = vmatpush1.bf16.msra.mxu0 %v5011_v41  ;;  %3851 = vmatpush1.bf16.msra.mxu1 %v5014_v42  ;;  %v5105_v41 = vld [vmem:[%s5625_s19 + $0x5e4] ss:$16 sps:$4 sm:$0xff]   ;;  %v5108_v42 = vld [vmem:[%s5625_s19 + $0x5ec] ss:$16 sps:$4 sm:$0xff]  }
 0x341   : > { %3597 = vmatprep.subr.bf16.mxu0 %v5015_v43  ;;  %3853 = vmatprep.subr.bf16.mxu1 %v5018_v44  ;;  %v5107_v43 = vld [vmem:[%s5625_s19 + $0x5e0] ss:$16 sps:$4 sm:$0xff]   ;;  %v5110_v44 = vld [vmem:[%s5625_s19 + $0x5e8] ss:$16 sps:$4 sm:$0xff]  }
 0x343   : > { %2323 = vmatmul.mubr.f32.vlgmr.msra.gmra.mrb[0].mxu0 %v1413_v47  ;;  %2607 = vmatmul.mubr.f32.vlgmr.msra.gmra.mrb[0].mxu1 %v1413_v47  ;;  %v5113_v47 = vld [vmem:[%s5625_s19 + $0x600] ss:$16 sps:$4 sm:$0xff]  }
 0x344   : > { %3599 = vmatpush1.bf16.msra.mxu0 %v5017_v45  ;;  %3855 = vmatpush1.bf16.msra.mxu1 %v5020_v46  ;;  %v5111_v45 = vld [vmem:[%s5625_s19 + $0x604] ss:$16 sps:$4 sm:$0xff]   ;;  %v5114_v46 = vld [vmem:[%s5625_s19 + $0x60c] ss:$16 sps:$4 sm:$0xff]  }
 0x345   : > { %3601 = vmatprep.subr.bf16.mxu0 %v5021_v48  ;;  %3857 = vmatprep.subr.bf16.mxu1 %v5024_v49  ;;  %v5116_v48 = vld [vmem:[%s5625_s19 + $0x608] ss:$16 sps:$4 sm:$0xff]   ;;  %v1415_v49 = vld [vmem:[%s5643_s14 + $0x20] sm:$0xff] }
 0x346   : > { %2393 = vmatprep.mubr.f32.mxu0 %v1416_v50  ;;  %2677 = vmatprep.mubr.f32.mxu1 %v1416_v50  ;;  %v5117_v50 = vld [vmem:[%s5625_s19 + $0x624] ss:$16 sps:$4 sm:$0xff]  }
 0x348   : > { %3603 = vmatpush1.bf16.msra.mxu0 %v5023_v51  ;;  %3859 = vmatpush1.bf16.msra.mxu1 %v5026_v52  ;;  %v5120_v51 = vld [vmem:[%s5625_s19 + $0x62c] ss:$16 sps:$4 sm:$0xff]  }
 0x349   : > { %3605 = vmatprep.subr.bf16.mxu0 %v5027_v53  ;;  %3861 = vmatprep.subr.bf16.mxu1 %v5030_v54  ;;  %v1418_v52 = vld [vmem:[%s5643_s14 + $0x38] sm:$0xff]  ;;  %v5119_v53 = vld [vmem:[%s5625_s19 + $0x620] ss:$16 sps:$4 sm:$0xff]  }
 0x34a   : > { %v5122_v54 = vld [vmem:[%s5625_s19 + $0x628] ss:$16 sps:$4 sm:$0xff]  }
 0x34c   : > { %3607 = vmatpush1.bf16.msra.mxu0 %v5029_v55  ;;  %3863 = vmatpush1.bf16.msra.mxu1 %v5032_v56  ;;  %v5123_v55 = vld [vmem:[%s5625_s19 + $0x644] ss:$16 sps:$4 sm:$0xff]   ;;  %v5126_v56 = vld [vmem:[%s5625_s19 + $0x64c] ss:$16 sps:$4 sm:$0xff]  }
 0x34d   : > { %3609 = vmatprep.subr.bf16.mxu0 %v5033_v57  ;;  %3865 = vmatprep.subr.bf16.mxu1 %v5036_v58  ;;  %v5125_v57 = vld [vmem:[%s5625_s19 + $0x640] ss:$16 sps:$4 sm:$0xff]   ;;  %v5128_v58 = vld [vmem:[%s5625_s19 + $0x648] ss:$16 sps:$4 sm:$0xff]  }
 0x350   : > { %3611 = vmatpush1.bf16.msra.mxu0 %v5035_v59  ;;  %3867 = vmatpush1.bf16.msra.mxu1 %v5038_v60  ;;  %v5129_v59 = vld [vmem:[%s5625_s19 + $0x664] ss:$16 sps:$4 sm:$0xff]   ;;  %v5132_v60 = vld [vmem:[%s5625_s19 + $0x66c] ss:$16 sps:$4 sm:$0xff]  }
 0x351   : > { %3613 = vmatprep.subr.bf16.mxu0 %v5039_v61  ;;  %3869 = vmatprep.subr.bf16.mxu1 %v5042_v62  ;;  %v5131_v61 = vld [vmem:[%s5625_s19 + $0x660] ss:$16 sps:$4 sm:$0xff]   ;;  %v5134_v62 = vld [vmem:[%s5625_s19 + $0x668] ss:$16 sps:$4 sm:$0xff]  }
 0x354   : > { %3615 = vmatpush1.bf16.msra.mxu0 %v5041_v63  ;;  %3871 = vmatpush1.bf16.msra.mxu1 %v5044_v0  ;;  %v5135_v63 = vld [vmem:[%s5625_s19 + $0x684] ss:$16 sps:$4 sm:$0xff]   ;;  %v5138_v0 = vld [vmem:[%s5625_s19 + $0x68c] ss:$16 sps:$4 sm:$0xff]  }
 0x355   : > { %3617 = vmatprep.subr.bf16.mxu0 %v5045_v1  ;;  %3873 = vmatprep.subr.bf16.mxu1 %v5048_v2  ;;  %v5137_v1 = vld [vmem:[%s5625_s19 + $0x680] ss:$16 sps:$4 sm:$0xff]   ;;  %v5140_v2 = vld [vmem:[%s5625_s19 + $0x688] ss:$16 sps:$4 sm:$0xff]  }
 0x358   : > { %3619 = vmatpush1.bf16.msra.mxu0 %v5047_v3  ;;  %3875 = vmatpush1.bf16.msra.mxu1 %v5050_v4  ;;  %v5141_v3 = vld [vmem:[%s5625_s19 + $0x6a4] ss:$16 sps:$4 sm:$0xff]   ;;  %v5144_v4 = vld [vmem:[%s5625_s19 + $0x6ac] ss:$16 sps:$4 sm:$0xff]  }
 0x359   : > { %3621 = vmatprep.subr.bf16.mxu0 %v5051_v5  ;;  %3877 = vmatprep.subr.bf16.mxu1 %v5054_v6  ;;  %v5143_v5 = vld [vmem:[%s5625_s19 + $0x6a0] ss:$16 sps:$4 sm:$0xff]   ;;  %v5146_v6 = vld [vmem:[%s5625_s19 + $0x6a8] ss:$16 sps:$4 sm:$0xff]  }
 0x35c   : > { %3623 = vmatpush1.bf16.msra.mxu0 %v5053_v7  ;;  %3879 = vmatpush1.bf16.msra.mxu1 %v5056_v8  ;;  %v5147_v7 = vld [vmem:[%s5625_s19 + $0x6c4] ss:$16 sps:$4 sm:$0xff]   ;;  %v5150_v8 = vld [vmem:[%s5625_s19 + $0x6cc] ss:$16 sps:$4 sm:$0xff]  }
 0x35d   : > { %3625 = vmatprep.subr.bf16.mxu0 %v5057_v9  ;;  %3881 = vmatprep.subr.bf16.mxu1 %v5060_v10  ;;  %v5149_v9 = vld [vmem:[%s5625_s19 + $0x6c0] ss:$16 sps:$4 sm:$0xff]   ;;  %v5152_v10 = vld [vmem:[%s5625_s19 + $0x6c8] ss:$16 sps:$4 sm:$0xff]  }
 0x360   : > { %3627 = vmatpush1.bf16.msra.mxu0 %v5059_v11  ;;  %3883 = vmatpush1.bf16.msra.mxu1 %v5062_v12  ;;  %v5153_v11 = vld [vmem:[%s5625_s19 + $0x6e4] ss:$16 sps:$4 sm:$0xff]   ;;  %v5156_v12 = vld [vmem:[%s5625_s19 + $0x6ec] ss:$16 sps:$4 sm:$0xff]  }
 0x361   : > { %3629 = vmatprep.subr.bf16.mxu0 %v5063_v13  ;;  %3885 = vmatprep.subr.bf16.mxu1 %v5066_v14  ;;  %v5155_v13 = vld [vmem:[%s5625_s19 + $0x6e0] ss:$16 sps:$4 sm:$0xff]   ;;  %v5158_v14 = vld [vmem:[%s5625_s19 + $0x6e8] ss:$16 sps:$4 sm:$0xff]  }
 0x364   : > { %3631 = vmatpush1.bf16.msra.mxu0 %v5065_v15  ;;  %3887 = vmatpush1.bf16.msra.mxu1 %v5068_v16  ;;  %v5159_v15 = vld [vmem:[%s5625_s19 + $0x704] ss:$16 sps:$4 sm:$0xff]   ;;  %v5162_v16 = vld [vmem:[%s5625_s19 + $0x70c] ss:$16 sps:$4 sm:$0xff]  }
 0x365   : > { %3633 = vmatprep.subr.bf16.mxu0 %v5069_v17  ;;  %3889 = vmatprep.subr.bf16.mxu1 %v5072_v18  ;;  %v5161_v17 = vld [vmem:[%s5625_s19 + $0x700] ss:$16 sps:$4 sm:$0xff]   ;;  %v5164_v18 = vld [vmem:[%s5625_s19 + $0x708] ss:$16 sps:$4 sm:$0xff]  }
 0x368   : > { %3635 = vmatpush1.bf16.msra.mxu0 %v5071_v19  ;;  %3891 = vmatpush1.bf16.msra.mxu1 %v5074_v20  ;;  %v5165_v19 = vld [vmem:[%s5625_s19 + $0x724] ss:$16 sps:$4 sm:$0xff]   ;;  %v5168_v20 = vld [vmem:[%s5625_s19 + $0x72c] ss:$16 sps:$4 sm:$0xff]  }
 0x369   : > { %3637 = vmatprep.subr.bf16.mxu0 %v5075_v21  ;;  %3893 = vmatprep.subr.bf16.mxu1 %v5078_v22  ;;  %v5167_v21 = vld [vmem:[%s5625_s19 + $0x720] ss:$16 sps:$4 sm:$0xff]   ;;  %v5170_v22 = vld [vmem:[%s5625_s19 + $0x728] ss:$16 sps:$4 sm:$0xff]  }
 0x36c   : > { %3639 = vmatpush1.bf16.msra.mxu0 %v5077_v23  ;;  %3895 = vmatpush1.bf16.msra.mxu1 %v5080_v24  ;;  %v5171_v23 = vld [vmem:[%s5625_s19 + $0x744] ss:$16 sps:$4 sm:$0xff]   ;;  %v5174_v24 = vld [vmem:[%s5625_s19 + $0x74c] ss:$16 sps:$4 sm:$0xff]  }
 0x36d   : > { %3641 = vmatprep.subr.bf16.mxu0 %v5081_v25  ;;  %3897 = vmatprep.subr.bf16.mxu1 %v5084_v26  ;;  %v5173_v25 = vld [vmem:[%s5625_s19 + $0x740] ss:$16 sps:$4 sm:$0xff]   ;;  %v5176_v26 = vld [vmem:[%s5625_s19 + $0x748] ss:$16 sps:$4 sm:$0xff]  }
 0x370   : > { %3643 = vmatpush1.bf16.msra.mxu0 %v5083_v27  ;;  %3899 = vmatpush1.bf16.msra.mxu1 %v5086_v28  ;;  %v5177_v27 = vld [vmem:[%s5625_s19 + $0x764] ss:$16 sps:$4 sm:$0xff]   ;;  %v5180_v28 = vld [vmem:[%s5625_s19 + $0x76c] ss:$16 sps:$4 sm:$0xff]  }
 0x371   : > { %3645 = vmatprep.subr.bf16.mxu0 %v5087_v29  ;;  %3901 = vmatprep.subr.bf16.mxu1 %v5090_v30  ;;  %v5179_v29 = vld [vmem:[%s5625_s19 + $0x760] ss:$16 sps:$4 sm:$0xff]   ;;  %v5182_v30 = vld [vmem:[%s5625_s19 + $0x768] ss:$16 sps:$4 sm:$0xff]  }
 0x374   : > { %3647 = vmatpush1.bf16.msra.mxu0 %v5089_v31  ;;  %3903 = vmatpush1.bf16.msra.mxu1 %v5092_v32  ;;  %v5183_v31 = vld [vmem:[%s5625_s19 + $0x784] ss:$16 sps:$4 sm:$0xff]   ;;  %v5186_v32 = vld [vmem:[%s5625_s19 + $0x78c] ss:$16 sps:$4 sm:$0xff]  }
 0x375   : > { %3649 = vmatprep.subr.bf16.mxu0 %v5093_v33  ;;  %3905 = vmatprep.subr.bf16.mxu1 %v5096_v34  ;;  %v5185_v33 = vld [vmem:[%s5625_s19 + $0x780] ss:$16 sps:$4 sm:$0xff]   ;;  %v5188_v34 = vld [vmem:[%s5625_s19 + $0x788] ss:$16 sps:$4 sm:$0xff]  }
 0x378   : > { %3651 = vmatpush1.bf16.msra.mxu0 %v5095_v35  ;;  %3907 = vmatpush1.bf16.msra.mxu1 %v5098_v36  ;;  %v5189_v35 = vld [vmem:[%s5625_s19 + $0x7a4] ss:$16 sps:$4 sm:$0xff]   ;;  %v5192_v36 = vld [vmem:[%s5625_s19 + $0x7ac] ss:$16 sps:$4 sm:$0xff]  }
 0x379   : > { %3653 = vmatprep.subr.bf16.mxu0 %v5099_v37  ;;  %3909 = vmatprep.subr.bf16.mxu1 %v5102_v38  ;;  %v5191_v37 = vld [vmem:[%s5625_s19 + $0x7a0] ss:$16 sps:$4 sm:$0xff]   ;;  %v5194_v38 = vld [vmem:[%s5625_s19 + $0x7a8] ss:$16 sps:$4 sm:$0xff]  }
 0x37c   : > { %3655 = vmatpush1.bf16.msra.mxu0 %v5101_v39  ;;  %3911 = vmatpush1.bf16.msra.mxu1 %v5104_v40  ;;  %v5195_v39 = vld [vmem:[%s5625_s19 + $0x7c4] ss:$16 sps:$4 sm:$0xff]   ;;  %v5198_v40 = vld [vmem:[%s5625_s19 + $0x7cc] ss:$16 sps:$4 sm:$0xff]  }
 0x37d   : > { %3657 = vmatprep.subr.bf16.mxu0 %v5105_v41  ;;  %3913 = vmatprep.subr.bf16.mxu1 %v5108_v42  ;;  %v5197_v41 = vld [vmem:[%s5625_s19 + $0x7c0] ss:$16 sps:$4 sm:$0xff]   ;;  %v5200_v42 = vld [vmem:[%s5625_s19 + $0x7c8] ss:$16 sps:$4 sm:$0xff]  }
 0x380   : > { %3659 = vmatpush1.bf16.msra.mxu0 %v5107_v43  ;;  %3915 = vmatpush1.bf16.msra.mxu1 %v5110_v44  ;;  %v5201_v43 = vld [vmem:[%s5625_s19 + $0x7e4] ss:$16 sps:$4 sm:$0xff]   ;;  %v5204_v44 = vld [vmem:[%s5625_s19 + $0x7ec] ss:$16 sps:$4 sm:$0xff]  }
 0x381   : > { %3661 = vmatprep.subr.bf16.mxu0 %v5111_v45  ;;  %3917 = vmatprep.subr.bf16.mxu1 %v5114_v46  ;;  %v5203_v45 = vld [vmem:[%s5625_s19 + $0x7e0] ss:$16 sps:$4 sm:$0xff]   ;;  %v5206_v46 = vld [vmem:[%s5625_s19 + $0x7e8] ss:$16 sps:$4 sm:$0xff]  }
 0x383   : > { %2394 = vmatmul.mubr.f32.vlgmr.msra.gmra.mrb[0].mxu0 %v1415_v49  ;;  %2678 = vmatmul.mubr.f32.vlgmr.msra.gmra.mrb[0].mxu1 %v1415_v49  ;;  %v1409_v49 = vld [vmem:[#allocation2 + $0x10] sm:$0xff] }
 0x384   : > { %3663 = vmatpush1.bf16.msra.mxu0 %v5113_v47  ;;  %3919 = vmatpush1.bf16.msra.mxu1 %v5116_v48  ;;  %v1417_v47 = vld [vmem:[%s5643_s14 + $0x30] sm:$0xff]  ;;  %v1407_v48 = vld [vmem:[#allocation2] sm:$0xff] }
 0x385   : > { %3665 = vmatprep.subr.bf16.mxu0 %v5117_v50  ;;  %3921 = vmatprep.subr.bf16.mxu1 %v5120_v51  ;;  %v1408_v50 = vld [vmem:[#allocation2 + $0x8] sm:$0xff]  ;;  %v1410_v51 = vld [vmem:[#allocation2 + $0x18] sm:$0xff] }
 0x386   : > { %2464 = vmatprep.mubr.f32.mxu0 %v1418_v52  ;;  %2748 = vmatprep.mubr.f32.mxu1 %v1418_v52 }
 0x388   : > { %3667 = vmatpush1.bf16.msra.mxu0 %v5119_v53  ;;  %3923 = vmatpush1.bf16.msra.mxu1 %v5122_v54 }
 0x389   : > { %3669 = vmatprep.subr.bf16.mxu0 %v5123_v55  ;;  %3925 = vmatprep.subr.bf16.mxu1 %v5126_v56 }
 0x38c   : > { %3671 = vmatpush1.bf16.msra.mxu0 %v5125_v57  ;;  %3927 = vmatpush1.bf16.msra.mxu1 %v5128_v58 }
 0x38d   : > { %3673 = vmatprep.subr.bf16.mxu0 %v5129_v59  ;;  %3929 = vmatprep.subr.bf16.mxu1 %v5132_v60  ;;  %v2773_v60 = vlaneseq (!%p3077_p1) }
 0x390   : > { %3675 = vmatpush1.bf16.msra.mxu0 %v5131_v61  ;;  %3931 = vmatpush1.bf16.msra.mxu1 %v5134_v62  ;;  %v2774_v61 = vshrl.u32 (!%p3077_p1), %v2773_v60, 7  ;;  %v2771_v62 = vld [vmem:[#allocation8] sm:$0xf] (!%p3077_p1) }
 0x391   : > { %3677 = vmatprep.subr.bf16.mxu0 %v5135_v63  ;;  %3933 = vmatprep.subr.bf16.mxu1 %v5138_v0 }
 0x392   : > { %v2775_v0 = vsub.s32 (!%p3077_p1), 0, %v2774_v61 }
 0x394   : > { %3679 = vmatpush1.bf16.msra.mxu0 %v5137_v1  ;;  %3935 = vmatpush1.bf16.msra.mxu1 %v5140_v2  ;;  %v2779_v1 = vsub.s32 (!%p3077_p1), 1, %v2774_v61  ;;  %v2783_v2 = vsub.s32 (!%p3077_p1), 2, %v2774_v61 }
 0x395   : > { %3681 = vmatprep.subr.bf16.mxu0 %v5141_v3  ;;  %3937 = vmatprep.subr.bf16.mxu1 %v5144_v4  ;;  %v2787_v3 = vsub.s32 (!%p3077_p1), 3, %v2774_v61 }
 0x398   : > { %3683 = vmatpush1.bf16.msra.mxu0 %v5143_v5  ;;  %3939 = vmatpush1.bf16.msra.mxu1 %v5146_v6 }
 0x399   : > { %3685 = vmatprep.subr.bf16.mxu0 %v5147_v7  ;;  %3941 = vmatprep.subr.bf16.mxu1 %v5150_v8  ;;  %v2776_v7 = vrot.slane (!%p3077_p1), %v2771_v62, %v2775_v0  ;;  %v2780_v8 = vrot.slane (!%p3077_p1), %v2771_v62, %v2779_v1 }
 0x39c   : > { %3687 = vmatpush1.bf16.msra.mxu0 %v5149_v9  ;;  %3943 = vmatpush1.bf16.msra.mxu1 %v5152_v10  ;;  %v2784_v9 = vrot.slane (!%p3077_p1), %v2771_v62, %v2783_v2  ;;  %v2788_v10 = vrot.slane (!%p3077_p1), %v2771_v62, %v2787_v3 }
 0x39d   : > { %3689 = vmatprep.subr.bf16.mxu0 %v5153_v11  ;;  %3945 = vmatprep.subr.bf16.mxu1 %v5156_v12 }
 0x3a0   : > { %3691 = vmatpush1.bf16.msra.mxu0 %v5155_v13  ;;  %3947 = vmatpush1.bf16.msra.mxu1 %v5158_v14 }
 0x3a1   : > { %3693 = vmatprep.subr.bf16.mxu0 %v5159_v15  ;;  %3949 = vmatprep.subr.bf16.mxu1 %v5162_v16 }
 0x3a4   : > { %3695 = vmatpush1.bf16.msra.mxu0 %v5161_v17  ;;  %3951 = vmatpush1.bf16.msra.mxu1 %v5164_v18 }
 0x3a5   : > { %3697 = vmatprep.subr.bf16.mxu0 %v5165_v19  ;;  %3953 = vmatprep.subr.bf16.mxu1 %v5168_v20 }
 0x3a8   : > { %3699 = vmatpush1.bf16.msra.mxu0 %v5167_v21  ;;  %3955 = vmatpush1.bf16.msra.mxu1 %v5170_v22  ;;  %v2813_v22 = vld [vmem:[#allocation3 + $0x8] sm:$0xff] (!%p3077_p1) }
 0x3a9   : > { %3701 = vmatprep.subr.bf16.mxu0 %v5171_v23  ;;  %3957 = vmatprep.subr.bf16.mxu1 %v5174_v24  ;;  %v2815_v23 = vld [vmem:[#allocation3 + $0x18] sm:$0xff] (!%p3077_p1)  ;;  %v2812_v24 = vld [vmem:[#allocation3] sm:$0xff] (!%p3077_p1) }
 0x3ac   : > { %3703 = vmatpush1.bf16.msra.mxu0 %v5173_v25  ;;  %3959 = vmatpush1.bf16.msra.mxu1 %v5176_v26  ;;  %v2814_v25 = vld [vmem:[#allocation3 + $0x10] sm:$0xff] (!%p3077_p1) }
 0x3ad   : > { %3705 = vmatprep.subr.bf16.mxu0 %v5177_v27  ;;  %3961 = vmatprep.subr.bf16.mxu1 %v5180_v28 }
 0x3b0   : > { %3707 = vmatpush1.bf16.msra.mxu0 %v5179_v29  ;;  %3963 = vmatpush1.bf16.msra.mxu1 %v5182_v30 }
 0x3b1   : > { %3709 = vmatprep.subr.bf16.mxu0 %v5183_v31  ;;  %3965 = vmatprep.subr.bf16.mxu1 %v5186_v32 }
 0x3b4   : > { %3711 = vmatpush1.bf16.msra.mxu0 %v5185_v33  ;;  %3967 = vmatpush1.bf16.msra.mxu1 %v5188_v34 }
 0x3b5   : > { %3713 = vmatprep.subr.bf16.mxu0 %v5189_v35  ;;  %3969 = vmatprep.subr.bf16.mxu1 %v5192_v36  ;;  %v2957_v35 = vstv (!%p3077_p1), %s2956_s12 }
 0x3b8   : > { %3715 = vmatpush1.bf16.msra.mxu0 %v5191_v37  ;;  %3971 = vmatpush1.bf16.msra.mxu1 %v5194_v38 }
 0x3b9   : > { %3717 = vmatprep.subr.bf16.mxu0 %v5195_v39  ;;  %3973 = vmatprep.subr.bf16.mxu1 %v5198_v40 }
 0x3bc   : > { %3719 = vmatpush1.bf16.msra.mxu0 %v5197_v41  ;;  %3975 = vmatpush1.bf16.msra.mxu1 %v5200_v42 }
 0x3bd   : > { %3721 = vmatprep.subr.bf16.mxu0 %v5201_v43  ;;  %3977 = vmatprep.subr.bf16.mxu1 %v5204_v44 }
 0x3c0   : > { %3723 = vmatpush1.bf16.msra.mxu0 %v5203_v45  ;;  %3979 = vmatpush1.bf16.msra.mxu1 %v5206_v46 }
 0x3c1   : > { %2816 = vmatprep.subr.mxu1 (!%p3077_p1), %v2813_v22  ;;  %2886 = vmatprep.subr.mxu0 (!%p3077_p1), %v2815_v23 }
 0x3c3   : > { %2465 = vmatmul.mubr.f32.vlgmr.msra.gmra.mrb[0].mxu0 %v1417_v47  ;;  %2749 = vmatmul.mubr.f32.vlgmr.msra.gmra.mrb[0].mxu1 %v1417_v47 }
 0x3c9   : > { %2817 = vmatpush1.xpose.msra.mxu1 (!%p3077_p1), %v2812_v24  ;;  %2887 = vmatpush1.xpose.msra.mxu0 (!%p3077_p1), %v2814_v25 }
 0x494   : > { %2766 = sbr.rel (%p3077_p1) target bundleno = 1571 (0x623), region = 72 }
 0x496   : > { %v2466_v52 = vpop.f32.mrb[0].mxu0  ;;  %v2750_v53 = vpop.f32.mrb[0].mxu1 }
 0x497   : > { %v2755_v54 = vadd.f32 %v2466_v52, %v1407_v48  ;;  %v2757_v55 = vadd.f32 %v2750_v53, %v1409_v49  ;;  %v2468_v56 = vpop.f32.mrb[1].mxu0  ;;  %v2752_v57 = vpop.f32.mrb[1].mxu1 }
 0x498   : > { %v2756_v58 = vadd.f32 %v2468_v56, %v1408_v50  ;;  %v2758_v59 = vadd.f32 %v2752_v57, %v1410_v51 }
 0x499   : > { %2759 = vst [vmem:[#allocation2] sm:$0xff] %v2755_v54  ;;  %2761 = vst [vmem:[#allocation2 + $0x10] sm:$0xff] %v2757_v55 }
 0x49a   : > { %2760 = vst [vmem:[#allocation2 + $0x8] sm:$0xff] %v2756_v58  ;;  %2762 = vst [vmem:[#allocation2 + $0x18] sm:$0xff] %v2758_v59 }
 0x4a0   : > { %v2767_v63 = vld [vmem:[#allocation2] sm:$0xff]  ;;  %v2769_v5 = vld [vmem:[#allocation2 + $0x10] sm:$0xff] }
 0x4a1   : > { %v2768_v4 = vld [vmem:[#allocation2 + $0x8] sm:$0xff]  ;;  %v2770_v6 = vld [vmem:[#allocation2 + $0x18] sm:$0xff]  ;;  %v2793_v11 = vadd.f32 %v2776_v7, %v2767_v63  ;;  %v2795_v13 = vadd.f32 %v2784_v9, %v2769_v5 }
 0x4a2   : > { %v2794_v12 = vadd.f32 %v2780_v8, %v2768_v4  ;;  %v2796_v14 = vadd.f32 %v2788_v10, %v2770_v6 }
 0x4a3   : > { %v2797_v15 = vmul.f32 %v2793_v11, %v2793_v11  ;;  %v2799_v17 = vmul.f32 %v2795_v13, %v2795_v13 }
 0x4a4   : > { %v2798_v16 = vmul.f32 %v2794_v12, %v2794_v12  ;;  %v2800_v18 = vmul.f32 %v2796_v14, %v2796_v14 }
 0x4a6   : > { %v2801_v19 = vadd.f32 %v2798_v16, %v2797_v15 }
 0x4a8   : > { %v2802_v20 = vadd.f32 %v2801_v19, %v2799_v17 }
 0x4aa   : > { %v2803_v21 = vadd.f32 %v2802_v20, %v2800_v18 }
 0x4ac   : > { %2804 = vadd.xlane.f32.xlu0 %v2803_v21 }
 0x539   : > { %v2805_v26 = vpop.xlane.xlu0 %2804 }
 0x53a   : > { %v2806_v27 = vmax.f32 %v2805_v26, 1e-24 }
 0x53c   : > { %5207 = vrsqrt.f32 %v2806_v27 }
 0x546   : > { %v5208_v28 = vpop.eup %5207 }
 0x547   : > { %v2809_v29 = vmul.f32 %v5208_v28, %v2794_v12  ;;  %v2811_v30 = vmul.f32 %v5208_v28, %v2796_v14  ;;  %v2808_v31 = vmul.f32 %v5208_v28, %v2793_v11  ;;  %v2810_v32 = vmul.f32 %v5208_v28, %v2795_v13 }
 0x549   : > { %2880 = vmatprep.mubr.f32.mxu1 %v2809_v29  ;;  %2950 = vmatprep.mubr.f32.mxu0 %v2811_v30 }
 0x54a   : > { %2881 = vmatmul.mubr.f32.vlgmr.msra.gmra.mrb[0].mxu1 %v2808_v31  ;;  %2951 = vmatmul.mubr.f32.vlgmr.msra.gmra.mrb[0].mxu0 %v2810_v32 }
 0x61d   : > { %v2882_v33 = vpop.f32.mrb[0].mxu1  ;;  %v2952_v34 = vpop.f32.mrb[0].mxu0 }
 0x61e   : > { %v2953_v36 = vadd.f32 %v2952_v34, %v2882_v33  ;;  %v2884_v37 = vpop.f32.mrb[1].mxu1  ;;  %v2954_v38 = vpop.f32.mrb[1].mxu0 }
 0x620   : > { %v2958_v39 = vmul.f32 %v2957_v35, %v2953_v36 }
 0x622   : > { %2960 = vst.msk [vmem:[#allocation13] sm:$0xff] %vm2959_vm0, %v2958_v39 }
 0x623 PF: > { %p4492_p4 = scmp.eq.s32.totalorder %s5467_s6, 2  ;;  %s5404_s19 = smov [#allocation13]  }
 0x624   : > { %s2968_s8 = sshll.u32 %s5404_s19, 4  ;;  %s2969_s8 = int_to_ptr.vmem [resolvable:$true] %s2968_s8 }
 0x625   : > { %s5323_s20 = scalar_lea.vmem %s2969_s8, 128  ;;  %p5330_p2 = scmp.lt.s32.totalorder %s2969_s8, %s2969_s8 }
 0x626   : > { %p5324_p5 = scmp.ne.s32.totalorder %s2969_s8, %s5323_s20  ;;  %p5331_p6 = scmp.lt.s32.totalorder %s5323_s20, %s5323_s20 }
 0x628   : > { %p5325_p12 = pnand %p5324_p5, %p4492_p4  ;;  %p5332_p13 = por %p5331_p6, %p5330_p2 }
 0x62a   : > { %p5326_p0 = pneg %p5325_p12 }
 0x62c   : > { %p5333_p3 = pnand %p5332_p13, %p5326_p0 }
 0x62e   : > { %5336 = shalt.err (!%p5333_p3)
}
 0x62f   : > { %s5337_s14 = scalar_lea.hbm %s5973_s7, 128 }
 0x630   : > { %p5338_p8 = scmp.ne.s32.totalorder %s5973_s7, %s5337_s14  ;;  %p5343_p9 = scmp.lt.u32.totalorder %s5337_s14, %s5973_s7 }
 0x632   : > { %p5339_p7 = pnand %p5338_p8, %p4492_p4 }
 0x634   : > { %p5340_p10 = pneg %p5339_p7 }
 0x636   : > { %p5345_p11 = pnand %p5343_p9, %p5340_p10 }
 0x638   : > { %5348 = shalt.err (!%p5345_p11)
}
 0x639   : > { %4468 = dma.vmem_to_hbm [thread:$0]  (%p4492_p4), %s2969_s8, 128, %s5973_s7, [#allocation7]  }
 0x63a   : > { %5378 = dma.done.wait (%p4492_p4), [#allocation7], 128  }
 0x63b   : > { %5380 = vsyncadd (%p4492_p4), [#allocation7], 4294967168 }
 0x63c PF: > { %p21_p1 = scmp.ge.s32.totalorder %s5566_s21, 5   ;;  %s5989_s26 = smov %s5387_s27 }
 0x63d   : > { %s5990_s27 = smov %s5391_s28  ;;  %s5991_s28 = smov %s5576_s13 }
 0x63e   : > { %s5992_s29 = smov %s5566_s21  ;;  %23 = sbr.rel (!%p21_p1) target bundleno = 8 (0x8), region = 108 }
 0x645   :  { %2981 = vsyncpa [#allocation6], 1 }
 0x646   :  { %2983 = vsyncpa [#allocation6 + $0x1], 1 }
 0x647   :  { %2984 = vsyncpa [#allocation9], 1 }
 0x648   :  { %2985 = vsyncpa [#allocation12], 1 }
 0x649   :  { %2986 = vsyncpa [#allocation7], 1 }
 0x64a   :  { %2988 = vsyncpa [#allocation7 + $0x1], 1 }

</bundles_post_ra>
